<compile_context>
chip_gen: v5e
topology: v5e:2x2
jax: 0.10.0
libtpu: 0.0.40
codegen_flags: <defaults>
</compile_context>

<pallas_src>
import jax
import jax.numpy as jnp
from jax import lax
from jax.experimental import pallas as pl
from jax.experimental.pallas import tpu as pltpu

LN_EPS = 1e-5


def _erf_poly(x):
    # Abramowitz & Stegun 7.1.26 (max abs err ~1.5e-7).  Uses only ops with
    # guaranteed Mosaic lowerings (mul/add/div/abs/exp/where).
    a1, a2, a3, a4, a5 = (0.254829592, -0.284496736, 1.421413741,
                          -1.453152027, 1.061405429)
    p = 0.3275911
    ax = jnp.abs(x)
    t = 1.0 / (1.0 + p * ax)
    poly = ((((a5 * t + a4) * t + a3) * t + a2) * t + a1) * t
    y = 1.0 - poly * jnp.exp(-ax * ax)
    return jnp.where(x >= 0, y, -y)


def _gelu_exact(x):
    # Matches torch.nn.GELU() default (erf-based, not tanh approximation).
    return 0.5 * x * (1.0 + _erf_poly(x * 0.7071067811865476))


def _layernorm_cols(x, gamma, beta):
    # LayerNorm over embed_dims, which is the SUBLANE (first) axis in the
    # transposed (D, tokens) layout; gamma/beta are (D, 1) columns.
    mu = jnp.mean(x, axis=0, keepdims=True)
    var = jnp.mean((x - mu) * (x - mu), axis=0, keepdims=True)
    return (x - mu) * lax.rsqrt(var + LN_EPS) * gamma + beta


def mixer_kernel(x_ref,            # (D, BT*P)       f32, lane-dense tokens
                 w1t_ref,          # (BT*P, BT*PM)   f32, kron(I_BT, w1p.T)
                 w2t_ref,          # (BT*PM, BT*P)   f32, kron(I_BT, w2p.T)
                 wc1_ref,          # (CM, D)         f32, torch layout
                 bc1_ref,          # (CM, 1)         f32
                 wc2_ref,          # (D, CM)         f32, torch layout
                 bc2_ref,          # (D, 1)          f32
                 g1_ref, be1_ref,  # (D, 1)          f32  norm1 gamma/beta
                 g2_ref, be2_ref,  # (D, 1)          f32  norm2 gamma/beta
                 o_ref):           # (D, BT*P)
    x = x_ref[...].astype(jnp.float32)                               # (D, cols)

    # ---- branch 1: x + patch_mixer(norm1(x).T).T  (transposed layout) -------
    xn1 = _layernorm_cols(x, g1_ref[...], be1_ref[...])              # (D, cols)
    # Block-diagonal weights make batched patch mixing a single plain 2-D
    # matmul in the native layout -> no in-kernel slices/concats/transposes.
    h = jnp.dot(xn1, w1t_ref[...], preferred_element_type=jnp.float32)   # (D, BT*PM)
    h = _gelu_exact(h)
    pm = jnp.dot(h, w2t_ref[...], preferred_element_type=jnp.float32)    # (D, cols)
    x1 = x + pm                                        # (Dropout = identity, eval mode.)

    # ---- branch 2: x1 + channel_mixer(norm2(x1)) -----------------------------
    xn2 = _layernorm_cols(x1, g2_ref[...], be2_ref[...])             # (D, cols)
    h2 = jnp.dot(wc1_ref[...], xn2,
                 preferred_element_type=jnp.float32) + bc1_ref[...]  # (CM, cols)
    h2 = _gelu_exact(h2)
    cm = jnp.dot(wc2_ref[...], h2,
                 preferred_element_type=jnp.float32) + bc2_ref[...]  # (D, cols)

    o_ref[...] = (x1 + cm).astype(o_ref.dtype)


def _per_step_vmem_bytes(bt, num_patches, dim, patch_mix, channel_mix):
    cols = bt * num_patches
    w_patch = 2 * (bt * num_patches) * (bt * patch_mix) * 4   # two block-diag f32 weights
    w_chan = 2 * channel_mix * dim * 4                        # channel-mixer weights
    small = 4 * (channel_mix + 5 * dim)                       # biases + LN params
    io = 2 * 2 * dim * cols * 4                               # in+out blocks, double-buffered
    acts = (7 * dim + channel_mix) * cols * 4                 # live f32 temporaries
    return 2 * (w_patch + w_chan + small) + io + acts         # invariant operands double-buffered


def _pick_bt(batch, num_patches, dim, patch_mix, channel_mix, budget_bytes=16 << 20):
    """Prefer the WHOLE batch in one grid step: per-step overhead (~0.35 us)
    dominates this tiny kernel on every generation, and at this size even v7x's
    two TensorCores are not worth sharding ~100 KB of work.  Split only if the
    per-step footprint would exceed a VMEM budget that is safe on v7x (64 MiB
    total / 32 MiB default scoped) as well as v5e/v6e.  When splitting, the
    lane-dim block (BT*P) must be a multiple of 128."""
    for bt in sorted((d for d in range(1, batch + 1) if batch % d == 0), reverse=True):
        lane_ok = (bt == batch) or ((bt * num_patches) % 128 == 0)
        if lane_ok and _per_step_vmem_bytes(bt, num_patches, dim,
                                            patch_mix, channel_mix) <= budget_bytes:
            return bt
    return batch


@jax.jit
def mlp_mixer_layer(x, params):
    B, P, D = x.shape
    # All parameters are in torch layouts: Linear weight = (out_features, in_features).
    w1p, w2p, wc1, bc1, wc2, bc2, g1, be1, g2, be2 = params
    PM = w1p.shape[0]
    CM = wc1.shape[0]

    BT = _pick_bt(B, P, D, PM, CM)
    assert B % BT == 0 and (BT == B or (BT * P) % 128 == 0)
    cols = BT * P

    # Lane-dense presentation: tokens on the 128-wide lane axis (D=32 on sublanes).
    # Wrapper-side transpose of 64 KB is trivial XLA plumbing.
    x_t = x.reshape(B * P, D).T                                   # (D, B*P)

    # Block-diagonal patch-mixer weights (I_BT kron W^T) so patch mixing over the
    # whole batch block is ONE plain 2-D matmul inside the kernel.
    eye = jnp.eye(BT, dtype=jnp.float32)
    w1t_big = jnp.kron(eye, w1p.T.astype(jnp.float32))            # (BT*P, BT*PM)
    w2t_big = jnp.kron(eye, w2p.T.astype(jnp.float32))            # (BT*PM, BT*P)

    bc1c = bc1.reshape(CM, 1).astype(jnp.float32)
    bc2c = bc2.reshape(D, 1).astype(jnp.float32)
    g1c, be1c = g1.reshape(D, 1).astype(jnp.float32), be1.reshape(D, 1).astype(jnp.float32)
    g2c, be2c = g2.reshape(D, 1).astype(jnp.float32), be2.reshape(D, 1).astype(jnp.float32)

    est = _per_step_vmem_bytes(BT, P, D, PM, CM)
    vmem_limit = int(min(32 << 20, max(8 << 20, 4 * est)))        # safe on v5e/v6e/v7x

    rep = lambda shape: pl.BlockSpec(shape, lambda i: (0, 0))     # grid-invariant operands

    out_t = pl.pallas_call(
        mixer_kernel,
        out_shape=jax.ShapeDtypeStruct((D, B * P), x.dtype),
        grid_spec=pltpu.PrefetchScalarGridSpec(
            num_scalar_prefetch=0,
            grid=(B // BT,),
            in_specs=[
                pl.BlockSpec((D, cols), lambda i: (0, i)),        # x (batch block along lanes)
                rep((BT * P, BT * PM)),                           # kron(I, w1p.T)
                rep((BT * PM, BT * P)),                           # kron(I, w2p.T)
                rep((CM, D)),                                     # wc1
                rep((CM, 1)),                                     # bc1
                rep((D, CM)),                                     # wc2
                rep((D, 1)),                                      # bc2
                rep((D, 1)),                                      # gamma1
                rep((D, 1)),                                      # beta1
                rep((D, 1)),                                      # gamma2
                rep((D, 1)),                                      # beta2
            ],
            out_specs=pl.BlockSpec((D, cols), lambda i: (0, i)),
        ),
        compiler_params=pltpu.CompilerParams(
            dimension_semantics=("parallel",),
            vmem_limit_bytes=vmem_limit),
    )(x_t, w1t_big, w2t_big, wc1, bc1c, wc2, bc2c, g1c, be1c, g2c, be2c)

    return out_t.T.reshape(B, P, D)


def make_params(key, num_patches, embed_dims, patch_expansion, channel_expansion):
    PM = int(patch_expansion * embed_dims)
    CM = int(channel_expansion * embed_dims)
    ks = jax.random.split(key, 6)
    s = 0.02
    # torch.nn.Linear weight layout: (out_features, in_features).
    w1p = s * jax.random.normal(ks[0], (PM, num_patches), jnp.float32)   # patch Linear1 (no bias)
    w2p = s * jax.random.normal(ks[1], (num_patches, PM), jnp.float32)   # patch Linear2 (no bias)
    wc1 = s * jax.random.normal(ks[2], (CM, embed_dims), jnp.float32)    # channel Linear1
    bc1 = s * jax.random.normal(ks[3], (CM,), jnp.float32)
    wc2 = s * jax.random.normal(ks[4], (embed_dims, CM), jnp.float32)    # channel Linear2
    bc2 = s * jax.random.normal(ks[5], (embed_dims,), jnp.float32)
    g1 = jnp.ones((embed_dims,), jnp.float32)
    be1 = jnp.zeros((embed_dims,), jnp.float32)
    g2 = jnp.ones((embed_dims,), jnp.float32)
    be2 = jnp.zeros((embed_dims,), jnp.float32)
    return (w1p, w2p, wc1, bc1, wc2, bc2, g1, be1, g2, be2)


def _reference(x, params):
    # Pure-JAX f32 reference of the PyTorch forward (eval mode).
    w1p, w2p, wc1, bc1, wc2, bc2, g1, be1, g2, be2 = params

    def ln(v, g, b):
        mu = jnp.mean(v, -1, keepdims=True)
        var = jnp.mean((v - mu) ** 2, -1, keepdims=True)
        return (v - mu) / jnp.sqrt(var + LN_EPS) * g + b

    gelu = lambda v: 0.5 * v * (1.0 + lax.erf(v / jnp.sqrt(2.0)))
    z = jnp.swapaxes(ln(x, g1, be1), 1, 2)                    # (B, D, P)
    z = gelu(z @ w1p.T) @ w2p.T                               # (B, D, P)
    x1 = x + jnp.swapaxes(z, 1, 2)
    z2 = gelu(ln(x1, g2, be2) @ wc1.T + bc1) @ wc2.T + bc2
    return x1 + z2


if __name__ == "__main__":
    B, P, D = 8, 16, 32          # batch, num_patches, embed_dims
    patch_expansion = 0.5        # -> patch_mix_dims = 16
    channel_expansion = 4.0      # -> channel_mix_dims = 128

    key = jax.random.PRNGKey(0)
    kx, kp = jax.random.split(key)
    x = jax.random.normal(kx, (B, P, D), jnp.float32)
    params = make_params(kp, P, D, patch_expansion, channel_expansion)

    out = jax.block_until_ready(mlp_mixer_layer(x, params))

    ref = _reference(x, params)
    assert out.shape == (B, P, D)
    max_err = float(jnp.max(jnp.abs(out - ref)))
    assert jnp.allclose(out, ref, atol=1e-2, rtol=1e-2), f"mismatch vs reference (max abs err {max_err})"
    print("KERNEL_OK")
</pallas_src>

<mosaic_0001>
module attributes {stable_mosaic.version = 11 : i64} {
  func.func @mixer_kernel(%arg0: i32, %arg1: memref<32x128xf32, #tpu.memory_space<vmem>>, %arg2: memref<128x128xf32, #tpu.memory_space<vmem>>, %arg3: memref<128x128xf32, #tpu.memory_space<vmem>>, %arg4: memref<128x32xf32, #tpu.memory_space<vmem>>, %arg5: memref<128x1xf32, #tpu.memory_space<vmem>>, %arg6: memref<32x128xf32, #tpu.memory_space<vmem>>, %arg7: memref<32x1xf32, #tpu.memory_space<vmem>>, %arg8: memref<32x1xf32, #tpu.memory_space<vmem>>, %arg9: memref<32x1xf32, #tpu.memory_space<vmem>>, %arg10: memref<32x1xf32, #tpu.memory_space<vmem>>, %arg11: memref<32x1xf32, #tpu.memory_space<vmem>>, %arg12: memref<32x128xf32, #tpu.memory_space<vmem>>) attributes {dimension_semantics = [#tpu.dimension_semantics<parallel>], iteration_bounds = array<i64: 1>, scalar_prefetch = 0 : i64, scratch_operands = 0 : i64, tpu.core_type = #tpu.core_type<tc>, window_params = [{transform_indices = @transform_0, window_bounds = array<i64: 32, 128>}, {pipeline_mode = #tpu.pipeline_mode<synchronous>, transform_indices = @transform_1, window_bounds = array<i64: 128, 128>}, {pipeline_mode = #tpu.pipeline_mode<synchronous>, transform_indices = @transform_2, window_bounds = array<i64: 128, 128>}, {pipeline_mode = #tpu.pipeline_mode<synchronous>, transform_indices = @transform_3, window_bounds = array<i64: 128, 32>}, {pipeline_mode = #tpu.pipeline_mode<synchronous>, transform_indices = @transform_4, window_bounds = array<i64: 128, 1>}, {pipeline_mode = #tpu.pipeline_mode<synchronous>, transform_indices = @transform_5, window_bounds = array<i64: 32, 128>}, {pipeline_mode = #tpu.pipeline_mode<synchronous>, transform_indices = @transform_6, window_bounds = array<i64: 32, 1>}, {pipeline_mode = #tpu.pipeline_mode<synchronous>, transform_indices = @transform_7, window_bounds = array<i64: 32, 1>}, {pipeline_mode = #tpu.pipeline_mode<synchronous>, transform_indices = @transform_8, window_bounds = array<i64: 32, 1>}, {pipeline_mode = #tpu.pipeline_mode<synchronous>, transform_indices = @transform_9, window_bounds = array<i64: 32, 1>}, {pipeline_mode = #tpu.pipeline_mode<synchronous>, transform_indices = @transform_10, window_bounds = array<i64: 32, 1>}, {transform_indices = @transform_11, window_bounds = array<i64: 32, 128>}]} {
    %c0 = arith.constant 0 : index
    %c0_0 = arith.constant 0 : index
    %0 = vector.load %arg1[%c0, %c0_0] : memref<32x128xf32, #tpu.memory_space<vmem>>, vector<32x128xf32>
    %c0_1 = arith.constant 0 : index
    %c0_2 = arith.constant 0 : index
    %1 = vector.load %arg8[%c0_1, %c0_2] : memref<32x1xf32, #tpu.memory_space<vmem>>, vector<32x1xf32>
    %c0_3 = arith.constant 0 : index
    %c0_4 = arith.constant 0 : index
    %2 = vector.load %arg9[%c0_3, %c0_4] : memref<32x1xf32, #tpu.memory_space<vmem>>, vector<32x1xf32>
    %cst = arith.constant dense<0.000000e+00> : vector<128xf32>
    %3 = vector.multi_reduction <add>, %0, %cst [0] : vector<32x128xf32> to vector<128xf32>
    %4 = vector.shape_cast %3 : vector<128xf32> to vector<1x128xf32>
    %cst_5 = arith.constant 3.200000e+01 : f32
    %5 = vector.broadcast %cst_5 : f32 to vector<1x128xf32>
    %6 = arith.divf %4, %5 : vector<1x128xf32>
    %7 = vector.broadcast %6 : vector<1x128xf32> to vector<32x128xf32>
    %8 = arith.subf %0, %7 : vector<32x128xf32>
    %9 = vector.broadcast %6 : vector<1x128xf32> to vector<32x128xf32>
    %10 = arith.subf %0, %9 : vector<32x128xf32>
    %11 = arith.mulf %8, %10 : vector<32x128xf32>
    %cst_6 = arith.constant dense<0.000000e+00> : vector<128xf32>
    %12 = vector.multi_reduction <add>, %11, %cst_6 [0] : vector<32x128xf32> to vector<128xf32>
    %13 = vector.shape_cast %12 : vector<128xf32> to vector<1x128xf32>
    %cst_7 = arith.constant 3.200000e+01 : f32
    %14 = vector.broadcast %cst_7 : f32 to vector<1x128xf32>
    %15 = arith.divf %13, %14 : vector<1x128xf32>
    %16 = vector.broadcast %6 : vector<1x128xf32> to vector<32x128xf32>
    %17 = arith.subf %0, %16 : vector<32x128xf32>
    %cst_8 = arith.constant 9.99999974E-6 : f32
    %18 = vector.broadcast %cst_8 : f32 to vector<1x128xf32>
    %19 = arith.addf %15, %18 : vector<1x128xf32>
    %20 = math.rsqrt %19 : vector<1x128xf32>
    %21 = vector.broadcast %20 : vector<1x128xf32> to vector<32x128xf32>
    %22 = arith.mulf %17, %21 : vector<32x128xf32>
    %23 = vector.broadcast %1 : vector<32x1xf32> to vector<32x128xf32>
    %24 = arith.mulf %22, %23 : vector<32x128xf32>
    %25 = vector.broadcast %2 : vector<32x1xf32> to vector<32x128xf32>
    %26 = arith.addf %24, %25 : vector<32x128xf32>
    %c0_9 = arith.constant 0 : index
    %c0_10 = arith.constant 0 : index
    %27 = vector.load %arg2[%c0_9, %c0_10] : memref<128x128xf32, #tpu.memory_space<vmem>>, vector<128x128xf32>
    %cst_11 = arith.constant dense<0.000000e+00> : vector<32x128xf32>
    %28 = tpu.matmul %26, %27, %cst_11 {dimension_numbers = #tpu.dot_dimension_numbers<[1], [0], [0], [1], [0, 0, 1, 1], [], []>} : vector<32x128xf32>, vector<128x128xf32>, vector<32x128xf32> -> vector<32x128xf32>
    %cst_12 = arith.constant 5.000000e-01 : f32
    %29 = vector.broadcast %cst_12 : f32 to vector<32x128xf32>
    %30 = arith.mulf %29, %28 : vector<32x128xf32>
    %cst_13 = arith.constant 0.707106769 : f32
    %31 = vector.broadcast %cst_13 : f32 to vector<32x128xf32>
    %32 = arith.mulf %28, %31 : vector<32x128xf32>
    %33 = math.absf %32 : vector<32x128xf32>
    %cst_14 = arith.constant 0.327591091 : f32
    %34 = vector.broadcast %cst_14 : f32 to vector<32x128xf32>
    %35 = arith.mulf %34, %33 : vector<32x128xf32>
    %cst_15 = arith.constant 1.000000e+00 : f32
    %36 = vector.broadcast %cst_15 : f32 to vector<32x128xf32>
    %37 = arith.addf %36, %35 : vector<32x128xf32>
    %cst_16 = arith.constant 1.000000e+00 : f32
    %38 = vector.broadcast %cst_16 : f32 to vector<32x128xf32>
    %39 = arith.divf %38, %37 : vector<32x128xf32>
    %cst_17 = arith.constant 1.06140542 : f32
    %40 = vector.broadcast %cst_17 : f32 to vector<32x128xf32>
    %41 = arith.mulf %40, %39 : vector<32x128xf32>
    %cst_18 = arith.constant -1.45315206 : f32
    %42 = vector.broadcast %cst_18 : f32 to vector<32x128xf32>
    %43 = arith.addf %41, %42 : vector<32x128xf32>
    %44 = arith.mulf %43, %39 : vector<32x128xf32>
    %cst_19 = arith.constant 1.42141378 : f32
    %45 = vector.broadcast %cst_19 : f32 to vector<32x128xf32>
    %46 = arith.addf %44, %45 : vector<32x128xf32>
    %47 = arith.mulf %46, %39 : vector<32x128xf32>
    %cst_20 = arith.constant -0.284496725 : f32
    %48 = vector.broadcast %cst_20 : f32 to vector<32x128xf32>
    %49 = arith.addf %47, %48 : vector<32x128xf32>
    %50 = arith.mulf %49, %39 : vector<32x128xf32>
    %cst_21 = arith.constant 0.254829586 : f32
    %51 = vector.broadcast %cst_21 : f32 to vector<32x128xf32>
    %52 = arith.addf %50, %51 : vector<32x128xf32>
    %53 = arith.mulf %52, %39 : vector<32x128xf32>
    %cst_22 = arith.constant 0.000000e+00 : f32
    %54 = vector.broadcast %cst_22 : f32 to vector<32x128xf32>
    %55 = arith.subf %54, %33 : vector<32x128xf32>
    %56 = arith.mulf %55, %33 : vector<32x128xf32>
    %57 = math.exp %56 : vector<32x128xf32>
    %58 = arith.mulf %53, %57 : vector<32x128xf32>
    %cst_23 = arith.constant 1.000000e+00 : f32
    %59 = vector.broadcast %cst_23 : f32 to vector<32x128xf32>
    %60 = arith.subf %59, %58 : vector<32x128xf32>
    %cst_24 = arith.constant 0.000000e+00 : f32
    %61 = vector.broadcast %cst_24 : f32 to vector<32x128xf32>
    %62 = arith.cmpf oge, %32, %61 : vector<32x128xf32>
    %cst_25 = arith.constant 0.000000e+00 : f32
    %63 = vector.broadcast %cst_25 : f32 to vector<32x128xf32>
    %64 = arith.subf %63, %60 : vector<32x128xf32>
    %65 = arith.select %62, %60, %64 : vector<32x128xi1>, vector<32x128xf32>
    %cst_26 = arith.constant 1.000000e+00 : f32
    %66 = vector.broadcast %cst_26 : f32 to vector<32x128xf32>
    %67 = arith.addf %66, %65 : vector<32x128xf32>
    %68 = arith.mulf %30, %67 : vector<32x128xf32>
    %c0_27 = arith.constant 0 : index
    %c0_28 = arith.constant 0 : index
    %69 = vector.load %arg3[%c0_27, %c0_28] : memref<128x128xf32, #tpu.memory_space<vmem>>, vector<128x128xf32>
    %cst_29 = arith.constant dense<0.000000e+00> : vector<32x128xf32>
    %70 = tpu.matmul %68, %69, %cst_29 {dimension_numbers = #tpu.dot_dimension_numbers<[1], [0], [0], [1], [0, 0, 1, 1], [], []>} : vector<32x128xf32>, vector<128x128xf32>, vector<32x128xf32> -> vector<32x128xf32>
    %71 = arith.addf %0, %70 : vector<32x128xf32>
    %c0_30 = arith.constant 0 : index
    %c0_31 = arith.constant 0 : index
    %72 = vector.load %arg10[%c0_30, %c0_31] : memref<32x1xf32, #tpu.memory_space<vmem>>, vector<32x1xf32>
    %c0_32 = arith.constant 0 : index
    %c0_33 = arith.constant 0 : index
    %73 = vector.load %arg11[%c0_32, %c0_33] : memref<32x1xf32, #tpu.memory_space<vmem>>, vector<32x1xf32>
    %cst_34 = arith.constant dense<0.000000e+00> : vector<128xf32>
    %74 = vector.multi_reduction <add>, %71, %cst_34 [0] : vector<32x128xf32> to vector<128xf32>
    %75 = vector.shape_cast %74 : vector<128xf32> to vector<1x128xf32>
    %cst_35 = arith.constant 3.200000e+01 : f32
    %76 = vector.broadcast %cst_35 : f32 to vector<1x128xf32>
    %77 = arith.divf %75, %76 : vector<1x128xf32>
    %78 = vector.broadcast %77 : vector<1x128xf32> to vector<32x128xf32>
    %79 = arith.subf %71, %78 : vector<32x128xf32>
    %80 = vector.broadcast %77 : vector<1x128xf32> to vector<32x128xf32>
    %81 = arith.subf %71, %80 : vector<32x128xf32>
    %82 = arith.mulf %79, %81 : vector<32x128xf32>
    %cst_36 = arith.constant dense<0.000000e+00> : vector<128xf32>
    %83 = vector.multi_reduction <add>, %82, %cst_36 [0] : vector<32x128xf32> to vector<128xf32>
    %84 = vector.shape_cast %83 : vector<128xf32> to vector<1x128xf32>
    %cst_37 = arith.constant 3.200000e+01 : f32
    %85 = vector.broadcast %cst_37 : f32 to vector<1x128xf32>
    %86 = arith.divf %84, %85 : vector<1x128xf32>
    %87 = vector.broadcast %77 : vector<1x128xf32> to vector<32x128xf32>
    %88 = arith.subf %71, %87 : vector<32x128xf32>
    %cst_38 = arith.constant 9.99999974E-6 : f32
    %89 = vector.broadcast %cst_38 : f32 to vector<1x128xf32>
    %90 = arith.addf %86, %89 : vector<1x128xf32>
    %91 = math.rsqrt %90 : vector<1x128xf32>
    %92 = vector.broadcast %91 : vector<1x128xf32> to vector<32x128xf32>
    %93 = arith.mulf %88, %92 : vector<32x128xf32>
    %94 = vector.broadcast %72 : vector<32x1xf32> to vector<32x128xf32>
    %95 = arith.mulf %93, %94 : vector<32x128xf32>
    %96 = vector.broadcast %73 : vector<32x1xf32> to vector<32x128xf32>
    %97 = arith.addf %95, %96 : vector<32x128xf32>
    %c0_39 = arith.constant 0 : index
    %c0_40 = arith.constant 0 : index
    %98 = vector.load %arg4[%c0_39, %c0_40] : memref<128x32xf32, #tpu.memory_space<vmem>>, vector<128x32xf32>
    %cst_41 = arith.constant dense<0.000000e+00> : vector<128x128xf32>
    %99 = tpu.matmul %98, %97, %cst_41 {dimension_numbers = #tpu.dot_dimension_numbers<[1], [0], [0], [1], [0, 0, 1, 1], [], []>} : vector<128x32xf32>, vector<32x128xf32>, vector<128x128xf32> -> vector<128x128xf32>
    %c0_42 = arith.constant 0 : index
    %c0_43 = arith.constant 0 : index
    %100 = vector.load %arg5[%c0_42, %c0_43] : memref<128x1xf32, #tpu.memory_space<vmem>>, vector<128x1xf32>
    %101 = vector.broadcast %100 : vector<128x1xf32> to vector<128x128xf32>
    %102 = arith.addf %99, %101 : vector<128x128xf32>
    %cst_44 = arith.constant 5.000000e-01 : f32
    %103 = vector.broadcast %cst_44 : f32 to vector<128x128xf32>
    %104 = arith.mulf %103, %102 : vector<128x128xf32>
    %cst_45 = arith.constant 0.707106769 : f32
    %105 = vector.broadcast %cst_45 : f32 to vector<128x128xf32>
    %106 = arith.mulf %102, %105 : vector<128x128xf32>
    %107 = math.absf %106 : vector<128x128xf32>
    %cst_46 = arith.constant 0.327591091 : f32
    %108 = vector.broadcast %cst_46 : f32 to vector<128x128xf32>
    %109 = arith.mulf %108, %107 : vector<128x128xf32>
    %cst_47 = arith.constant 1.000000e+00 : f32
    %110 = vector.broadcast %cst_47 : f32 to vector<128x128xf32>
    %111 = arith.addf %110, %109 : vector<128x128xf32>
    %cst_48 = arith.constant 1.000000e+00 : f32
    %112 = vector.broadcast %cst_48 : f32 to vector<128x128xf32>
    %113 = arith.divf %112, %111 : vector<128x128xf32>
    %cst_49 = arith.constant 1.06140542 : f32
    %114 = vector.broadcast %cst_49 : f32 to vector<128x128xf32>
    %115 = arith.mulf %114, %113 : vector<128x128xf32>
    %cst_50 = arith.constant -1.45315206 : f32
    %116 = vector.broadcast %cst_50 : f32 to vector<128x128xf32>
    %117 = arith.addf %115, %116 : vector<128x128xf32>
    %118 = arith.mulf %117, %113 : vector<128x128xf32>
    %cst_51 = arith.constant 1.42141378 : f32
    %119 = vector.broadcast %cst_51 : f32 to vector<128x128xf32>
    %120 = arith.addf %118, %119 : vector<128x128xf32>
    %121 = arith.mulf %120, %113 : vector<128x128xf32>
    %cst_52 = arith.constant -0.284496725 : f32
    %122 = vector.broadcast %cst_52 : f32 to vector<128x128xf32>
    %123 = arith.addf %121, %122 : vector<128x128xf32>
    %124 = arith.mulf %123, %113 : vector<128x128xf32>
    %cst_53 = arith.constant 0.254829586 : f32
    %125 = vector.broadcast %cst_53 : f32 to vector<128x128xf32>
    %126 = arith.addf %124, %125 : vector<128x128xf32>
    %127 = arith.mulf %126, %113 : vector<128x128xf32>
    %cst_54 = arith.constant 0.000000e+00 : f32
    %128 = vector.broadcast %cst_54 : f32 to vector<128x128xf32>
    %129 = arith.subf %128, %107 : vector<128x128xf32>
    %130 = arith.mulf %129, %107 : vector<128x128xf32>
    %131 = math.exp %130 : vector<128x128xf32>
    %132 = arith.mulf %127, %131 : vector<128x128xf32>
    %cst_55 = arith.constant 1.000000e+00 : f32
    %133 = vector.broadcast %cst_55 : f32 to vector<128x128xf32>
    %134 = arith.subf %133, %132 : vector<128x128xf32>
    %cst_56 = arith.constant 0.000000e+00 : f32
    %135 = vector.broadcast %cst_56 : f32 to vector<128x128xf32>
    %136 = arith.cmpf oge, %106, %135 : vector<128x128xf32>
    %cst_57 = arith.constant 0.000000e+00 : f32
    %137 = vector.broadcast %cst_57 : f32 to vector<128x128xf32>
    %138 = arith.subf %137, %134 : vector<128x128xf32>
    %139 = arith.select %136, %134, %138 : vector<128x128xi1>, vector<128x128xf32>
    %cst_58 = arith.constant 1.000000e+00 : f32
    %140 = vector.broadcast %cst_58 : f32 to vector<128x128xf32>
    %141 = arith.addf %140, %139 : vector<128x128xf32>
    %142 = arith.mulf %104, %141 : vector<128x128xf32>
    %c0_59 = arith.constant 0 : index
    %c0_60 = arith.constant 0 : index
    %143 = vector.load %arg6[%c0_59, %c0_60] : memref<32x128xf32, #tpu.memory_space<vmem>>, vector<32x128xf32>
    %cst_61 = arith.constant dense<0.000000e+00> : vector<32x128xf32>
    %144 = tpu.matmul %143, %142, %cst_61 {dimension_numbers = #tpu.dot_dimension_numbers<[1], [0], [0], [1], [0, 0, 1, 1], [], []>} : vector<32x128xf32>, vector<128x128xf32>, vector<32x128xf32> -> vector<32x128xf32>
    %c0_62 = arith.constant 0 : index
    %c0_63 = arith.constant 0 : index
    %145 = vector.load %arg7[%c0_62, %c0_63] : memref<32x1xf32, #tpu.memory_space<vmem>>, vector<32x1xf32>
    %146 = vector.broadcast %145 : vector<32x1xf32> to vector<32x128xf32>
    %147 = arith.addf %144, %146 : vector<32x128xf32>
    %148 = arith.addf %71, %147 : vector<32x128xf32>
    %c0_64 = arith.constant 0 : index
    %c0_65 = arith.constant 0 : index
    %149 = vector.load %arg12[%c0_64, %c0_65] : memref<32x128xf32, #tpu.memory_space<vmem>>, vector<32x128xf32>
    tpu.vector_store %arg12[%c0_64, %c0_65], %148 {strides = array<i32>} : memref<32x128xf32, #tpu.memory_space<vmem>>, vector<32x128xf32>,
    return
  }
  func.func @transform_0(%arg0: i32) -> (i32, i32) {
    %c0_i32 = arith.constant 0 : i32
    %c0_i32_0 = arith.constant 0 : i32
    return %c0_i32, %arg0 : i32, i32
  }
  func.func @transform_1(%arg0: i32) -> (i32, i32) {
    %c0_i32 = arith.constant 0 : i32
    %c0_i32_0 = arith.constant 0 : i32
    %c0_i32_1 = arith.constant 0 : i32
    return %c0_i32, %c0_i32_0 : i32, i32
  }
  func.func @transform_2(%arg0: i32) -> (i32, i32) {
    %c0_i32 = arith.constant 0 : i32
    %c0_i32_0 = arith.constant 0 : i32
    %c0_i32_1 = arith.constant 0 : i32
    return %c0_i32, %c0_i32_0 : i32, i32
  }
  func.func @transform_3(%arg0: i32) -> (i32, i32) {
    %c0_i32 = arith.constant 0 : i32
    %c0_i32_0 = arith.constant 0 : i32
    %c0_i32_1 = arith.constant 0 : i32
    return %c0_i32, %c0_i32_0 : i32, i32
  }
  func.func @transform_4(%arg0: i32) -> (i32, i32) {
    %c0_i32 = arith.constant 0 : i32
    %c0_i32_0 = arith.constant 0 : i32
    %c0_i32_1 = arith.constant 0 : i32
    return %c0_i32, %c0_i32_0 : i32, i32
  }
  func.func @transform_5(%arg0: i32) -> (i32, i32) {
    %c0_i32 = arith.constant 0 : i32
    %c0_i32_0 = arith.constant 0 : i32
    %c0_i32_1 = arith.constant 0 : i32
    return %c0_i32, %c0_i32_0 : i32, i32
  }
  func.func @transform_6(%arg0: i32) -> (i32, i32) {
    %c0_i32 = arith.constant 0 : i32
    %c0_i32_0 = arith.constant 0 : i32
    %c0_i32_1 = arith.constant 0 : i32
    return %c0_i32, %c0_i32_0 : i32, i32
  }
  func.func @transform_7(%arg0: i32) -> (i32, i32) {
    %c0_i32 = arith.constant 0 : i32
    %c0_i32_0 = arith.constant 0 : i32
    %c0_i32_1 = arith.constant 0 : i32
    return %c0_i32, %c0_i32_0 : i32, i32
  }
  func.func @transform_8(%arg0: i32) -> (i32, i32) {
    %c0_i32 = arith.constant 0 : i32
    %c0_i32_0 = arith.constant 0 : i32
    %c0_i32_1 = arith.constant 0 : i32
    return %c0_i32, %c0_i32_0 : i32, i32
  }
  func.func @transform_9(%arg0: i32) -> (i32, i32) {
    %c0_i32 = arith.constant 0 : i32
    %c0_i32_0 = arith.constant 0 : i32
    %c0_i32_1 = arith.constant 0 : i32
    return %c0_i32, %c0_i32_0 : i32, i32
  }
  func.func @transform_10(%arg0: i32) -> (i32, i32) {
    %c0_i32 = arith.constant 0 : i32
    %c0_i32_0 = arith.constant 0 : i32
    %c0_i32_1 = arith.constant 0 : i32
    return %c0_i32, %c0_i32_0 : i32, i32
  }
  func.func @transform_11(%arg0: i32) -> (i32, i32) {
    %c0_i32 = arith.constant 0 : i32
    %c0_i32_0 = arith.constant 0 : i32
    return %c0_i32, %arg0 : i32, i32
  }
}

</mosaic_0001>

<bundles_post_ra>
// kernel: mlp_mixer_layer.1
= control target key start
LH: loop header
LB: loop body
LE: loop exit
PB: predicated region body
PF: predicated region fallthrough
CT: control target
= control target key end

     0   :  { %v1571_v0 = vmov 0   ;;  %v1572_v14 = vmov 32.0   ;;  %s2848_s7 = inlined_call_operand.vmem [shape: f32[32,1], index: 7, kind: input, shape index: {}]   ;;  %s2849_s8 = inlined_call_operand.vmem [shape: f32[32,1], index: 8, kind: input, shape index: {}]   ;;  %s2850_s9 = inlined_call_operand.vmem [shape: f32[32,1], index: 9, kind: input, shape index: {}]   ;;  %s2851_s0 = inlined_call_operand.vmem [shape: f32[32,128], index: 0, kind: input, shape index: {}]   ;;  %s2852_s10 = inlined_call_operand.vmem [shape: f32[32,1], index: 10, kind: input, shape index: {}]   ;;  %s2853_s4 = inlined_call_operand.vmem [shape: f32[128,1], index: 4, kind: input, shape index: {}]   ;;  %s2854_s1 = inlined_call_operand.vmem [shape: f32[128,128], index: 1, kind: input, shape index: {}]   ;;  %s2855_s6 = inlined_call_operand.vmem [shape: f32[32,1], index: 6, kind: input, shape index: {}]   ;;  %s2856_s2 = inlined_call_operand.vmem [shape: f32[128,128], index: 2, kind: input, shape index: {}]   ;;  %s2857_s3 = inlined_call_operand.vmem [shape: f32[128,32], index: 3, kind: input, shape index: {}]   ;;  %s2858_s5 = inlined_call_operand.vmem [shape: f32[32,128], index: 5, kind: input, shape index: {}]   ;;  %s2859_s11 = inlined_call_operand.vmem [shape: f32[32,128], index: 11, kind: output, shape index: {}]  }
   0x1   :  { %1484 = vset.pattern.permute.xlu2 %v1571_v0  ;;  %1483 = vset.pattern.permute.xlu1 %v1571_v0  ;;  %v44_v1 = vld [vmem:[%s2848_s7 + $0x10] sm:$0xff]  ;;  %v43_v2 = vld [vmem:[%s2848_s7 + $0x8] sm:$0xff]  ;;  %v42_v3 = vld [vmem:[%s2848_s7] sm:$0xff]  ;;  %1485 = vrcp.f32 %v1572_v14 }
   0x2   :  { %1482 = vset.pattern.permute.xlu0 %v1571_v0  ;;  %112 = vperm.xlu2 %1484, %v44_v1   ;;  %v48_v4 = vld [vmem:[%s2849_s8 + $0x10] sm:$0xff]  ;;  %v47_v5 = vld [vmem:[%s2849_s8 + $0x8] sm:$0xff]  ;;  %v46_v6 = vld [vmem:[%s2849_s8] sm:$0xff] }
   0x3   :  { %107 = vperm.xlu1 %1483, %v43_v2   ;;  %102 = vperm.xlu0 %1482, %v42_v3   ;;  %v405_v7 = vld [vmem:[%s2850_s9 + $0x18] sm:$0xff]  ;;  %v1663_v10 = vld [vmem:[%s2851_s0] sm:$0xff]  ;;  %v1668_v11 = vld [vmem:[%s2851_s0 + $0x8] sm:$0xff] }
   0x4   :  { %v49_v8 = vld [vmem:[%s2849_s8 + $0x18] sm:$0xff]  ;;  %v50_v12 = vadd.f32 %v1668_v11, %v1663_v10  ;;  %v1675_v13 = vld [vmem:[%s2851_s0 + $0x10] sm:$0xff]  ;;  %v403_v16 = vld [vmem:[%s2850_s9 + $0x8] sm:$0xff] }
   0x5   :  { %v45_v9 = vld [vmem:[%s2848_s7 + $0x18] sm:$0xff]  ;;  %v404_v19 = vld [vmem:[%s2850_s9 + $0x10] sm:$0xff]  ;;  %v407_v26 = vld [vmem:[%s2852_s10 + $0x8] sm:$0xff] }
   0x6   :  { %v51_v15 = vadd.f32 %v50_v12, %v1675_v13  ;;  %v1684_v17 = vld [vmem:[%s2851_s0 + $0x18] sm:$0xff]  ;;  %v402_v28 = vld [vmem:[%s2850_s9] sm:$0xff]  ;;  %v408_v29 = vld [vmem:[%s2852_s10 + $0x10] sm:$0xff] }
   0x7   :  { %v409_v18 = vld [vmem:[%s2852_s10 + $0x18] sm:$0xff]  ;;  %v1486_v22 = vpop.eup %1485  ;;  %v531_v37 = vld [vmem:[%s2853_s4 + $0x70] sm:$0xff]  ;;  %v406_v38 = vld [vmem:[%s2852_s10] sm:$0xff] }
   0x8   :  { %v52_v20 = vadd.f32 %v51_v15, %v1684_v17  ;;  %v60_v24 = vmul.f32 32.0, %v1486_v22  ;;  %vm64_vm0 = vweird.f32 %v1486_v22  ;;  %v532_v39 = vld [vmem:[%s2853_s4 + $0x78] sm:$0xff]  ;;  %v530_v49 = vld [vmem:[%s2853_s4 + $0x68] sm:$0xff]  ;;  %v529_v50 = vld [vmem:[%s2853_s4 + $0x60] sm:$0xff] }
   0x9   :  { %v528_v48 = vld [vmem:[%s2853_s4 + $0x58] sm:$0xff]  ;;  %v525_v54 = vld [vmem:[%s2853_s4 + $0x40] sm:$0xff]  ;;  %v527_v55 = vld [vmem:[%s2853_s4 + $0x50] sm:$0xff] }
   0xa   :  { %136 = vperm.xlu2 %1484, %v48_v4   ;;  %v53_v21 = vrot.slane %v52_v20, 4  ;;  %v61_v27 = vsub.f32 1.0, %v60_v24  ;;  %v526_v56 = vld [vmem:[%s2853_s4 + $0x48] sm:$0xff]  ;;  %v163_v59 = vld [vmem:[%s2854_s1 + $0x78] sm:$0xff]  ;;  %v162_v60 = vld [vmem:[%s2854_s1 + $0x70] sm:$0xff] }
   0xb   :  { %131 = vperm.xlu1 %1483, %v47_v5   ;;  %126 = vperm.xlu0 %1482, %v46_v6   ;;  %v522_v61 = vld [vmem:[%s2853_s4 + $0x28] sm:$0xff]  ;;  %v524_v62 = vld [vmem:[%s2853_s4 + $0x38] sm:$0xff]  ;;  %v523_v63 = vld [vmem:[%s2853_s4 + $0x30] sm:$0xff] }
   0xc   :  { %v54_v23 = vadd.f32 %v53_v21, %v52_v20  ;;  %v62_v31 = vmul.f32 %v1486_v22, %v61_v27  ;;  %164 = vmatpush.msra.mxu0 %v163_v59  ;;  %v161_v2 = vld [vmem:[%s2854_s1 + $0x68] sm:$0xff]  ;;  %v160_v3 = vld [vmem:[%s2854_s1 + $0x60] sm:$0xff]  ;;  %v159_v4 = vld [vmem:[%s2854_s1 + $0x58] sm:$0xff] }
   0xd   :  { %v519_v5 = vld [vmem:[%s2853_s4 + $0x10] sm:$0xff]  ;;  %v521_v6 = vld [vmem:[%s2853_s4 + $0x20] sm:$0xff]  ;;  %v157_v14 = vld [vmem:[%s2854_s1 + $0x48] sm:$0xff] }
   0xe   :  { %v55_v25 = vrot.slane %v54_v23, 2  ;;  %v63_v33 = vadd.f32 %v1486_v22, %v62_v31  ;;  %165 = vmatpush.msra.mxu0 %v162_v60  ;;  %v156_v15 = vld [vmem:[%s2854_s1 + $0x40] sm:$0xff]  ;;  %v153_v24 = vld [vmem:[%s2854_s1 + $0x28] sm:$0xff]  ;;  %v151_v27 = vld [vmem:[%s2854_s1 + $0x18] sm:$0xff] }
   0xf   :  { %v517_v20 = vld [vmem:[%s2853_s4] sm:$0xff]  ;;  %v149_v31 = vld [vmem:[%s2854_s1 + $0x8] sm:$0xff] }
  0x10   :  { %v56_v30 = vadd.f32 %v55_v25, %v54_v23  ;;  %v1702_v35 = vsel %vm64_vm0, %v1486_v22, %v63_v33  ;;  %166 = vmatpush.msra.mxu0 %v161_v2  ;;  %v154_v22 = vld [vmem:[%s2854_s1 + $0x30] sm:$0xff]  ;;  %v152_v25 = vld [vmem:[%s2854_s1 + $0x20] sm:$0xff] }
  0x11   :  { %v148_v33 = vld [vmem:[%s2854_s1] sm:$0xff] }
  0x12   :  { %470 = vperm.xlu2 %1484, %v405_v7   ;;  %v57_v32 = vrot.slane %v56_v30, 1  ;;  %167 = vmatpush.msra.mxu0 %v160_v3  ;;  %v520_v7 = vld [vmem:[%s2853_s4 + $0x18] sm:$0xff] }
  0x13   :  { %141 = vperm.xlu1 %1483, %v49_v8   ;;  %117 = vperm.xlu0 %1482, %v45_v9   ;;  %v158_v9 = vld [vmem:[%s2854_s1 + $0x50] sm:$0xff]  ;;  %v364_v3 = vld [vmem:[%s2856_s2 + $0x58] sm:$0xff] }
  0x14   :  { %v58_v34 = vadd.f32 %v57_v32, %v56_v30  ;;  %168 = vmatpush.msra.mxu0 %v159_v4  ;;  %v150_v30 = vld [vmem:[%s2854_s1 + $0x10] sm:$0xff] }
  0x16   :  { %v66_v36 = vmul.f32 %v1702_v35, %v58_v34  ;;  %169 = vmatpush.msra.mxu0 %v158_v9  ;;  %v361_v9 = vld [vmem:[%s2856_s2 + $0x40] sm:$0xff] }
  0x18   :  { %v1715_v40 = vsub.f32 %v1663_v10, %v66_v36  ;;  %v1718_v41 = vsub.f32 %v1668_v11, %v66_v36  ;;  %v1721_v42 = vsub.f32 %v1675_v13, %v66_v36  ;;  %v1728_v45 = vsub.f32 %v1684_v17, %v66_v36  ;;  %170 = vmatpush.msra.mxu0 %v157_v14  ;;  %v360_v14 = vld [vmem:[%s2856_s2 + $0x38] sm:$0xff] }
  0x1a   :  { %460 = vperm.xlu2 %1484, %v403_v16   ;;  %v71_v43 = vmul.f32 %v1715_v40, %v1715_v40  ;;  %v72_v44 = vmul.f32 %v1718_v41, %v1718_v41  ;;  %v73_v46 = vmul.f32 %v1721_v42, %v1721_v42  ;;  %v74_v51 = vmul.f32 %v1728_v45, %v1728_v45  ;;  %v1371_v16 = vld [vmem:[%s2855_s6] sm:$0xff] }
  0x1b   :  { %494 = vperm.xlu1 %1483, %v409_v18   ;;  %465 = vperm.xlu0 %1482, %v404_v19   ;;  %v155_v18 = vld [vmem:[%s2854_s1 + $0x38] sm:$0xff]  ;;  %v518_v19 = vld [vmem:[%s2853_s4 + $0x8] sm:$0xff] }
  0x1c   :  { %v75_v47 = vadd.f32 %v72_v44, %v71_v43  ;;  %171 = vmatpush.msra.mxu0 %v156_v15 }
  0x1e   :  { %v76_v52 = vadd.f32 %v75_v47, %v73_v46  ;;  %172 = vmatpush.msra.mxu0 %v155_v18 }
  0x20   :  { %v77_v53 = vadd.f32 %v76_v52, %v74_v51  ;;  %173 = vmatpush.msra.mxu0 %v154_v22  ;;  %v357_v22 = vld [vmem:[%s2856_s2 + $0x20] sm:$0xff] }
  0x22   :  { %484 = vperm.xlu2 %1484, %v407_v26   ;;  %v78_v57 = vrot.slane %v77_v53, 4  ;;  %174 = vmatpush.msra.mxu0 %v153_v24  ;;  %v1374_v26 = vld [vmem:[%s2855_s6 + $0x18] sm:$0xff] }
  0x23   :  { %455 = vperm.xlu1 %1483, %v402_v28   ;;  %489 = vperm.xlu0 %1482, %v408_v29   ;;  %v1372_v28 = vld [vmem:[%s2855_s6 + $0x8] sm:$0xff]  ;;  %v1373_v29 = vld [vmem:[%s2855_s6 + $0x10] sm:$0xff] }
  0x24   :  { %v79_v58 = vadd.f32 %v78_v57, %v77_v53  ;;  %175 = vmatpush.msra.mxu0 %v152_v25 }
  0x26   :  { %v80_v0 = vrot.slane %v79_v58, 2  ;;  %176 = vmatpush.msra.mxu0 %v151_v27  ;;  %v356_v27 = vld [vmem:[%s2856_s2 + $0x18] sm:$0xff] }
  0x28   :  { %v81_v1 = vadd.f32 %v80_v0, %v79_v58  ;;  %177 = vmatpush.msra.mxu0 %v150_v30  ;;  %v365_v0 = vld [vmem:[%s2856_s2 + $0x60] sm:$0xff] }
  0x2a   :  { %605 = vperm.xlu2 %1484, %v531_v37   ;;  %v82_v8 = vrot.slane %v81_v1, 1  ;;  %178 = vmatpush.msra.mxu0 %v149_v31  ;;  %v355_v31 = vld [vmem:[%s2856_s2 + $0x10] sm:$0xff] }
  0x2b   :  { %479 = vperm.xlu0 %1482, %v406_v38   ;;  %610 = vperm.xlu1 %1483, %v532_v39  }
  0x2c   :  { %v83_v12 = vadd.f32 %v82_v8, %v81_v1  ;;  %179 = vmatpush.msra.mxu0 %v148_v33 }
  0x2e   :  { %v84_v21 = vmul.f32 %v83_v12, %v1702_v35 }
  0x30   :  { %v85_v23 = vadd.f32 1e-05, %v84_v21 }
  0x32   :  { %590 = vperm.xlu2 %1484, %v528_v48   ;;  %1487 = vrsqrt.f32 %v85_v23  ;;  %vm92_vm1 = vweird.f32 %v85_v23 }
  0x33   :  { %600 = vperm.xlu0 %1482, %v530_v49   ;;  %595 = vperm.xlu1 %1483, %v529_v50  }
  0x38   :  { %v1488_v32 = vpop.eup %1487 }
  0x39   :  { %v87_v34 = vmul.f32 %v1488_v32, %v85_v23  ;;  %vm93_vm2 = vweird.f32 %v1488_v32 }
  0x3a   :  { %575 = vperm.xlu2 %1484, %v525_v54   ;;  %vm94_vm3 = vmor %vm92_vm1, %vm93_vm2 }
  0x3b   :  { %585 = vperm.xlu0 %1482, %v527_v55   ;;  %580 = vperm.xlu1 %1483, %v526_v56   ;;  %v88_v36 = vmul.f32 %v1488_v32, %v87_v34 }
  0x3d   :  { %v89_v37 = vmul.f32 0.5, %v88_v36  ;;  %v354_v36 = vld [vmem:[%s2856_s2 + $0x8] sm:$0xff] }
  0x3f   :  { %v90_v38 = vsub.f32 1.5, %v89_v37  ;;  %v353_v37 = vld [vmem:[%s2856_s2] sm:$0xff] }
  0x41   :  { %v91_v39 = vmul.f32 %v1488_v32, %v90_v38 }
  0x42   :  { %560 = vperm.xlu2 %1484, %v522_v61  }
  0x43   :  { %570 = vperm.xlu0 %1482, %v524_v62   ;;  %565 = vperm.xlu1 %1483, %v523_v63   ;;  %v95_v43 = vsel %vm94_vm3, %v1488_v32, %v91_v39 }
  0x44   :  { %v96_v46 = vmul.f32 %v95_v43, %v1715_v40  ;;  %v97_v50 = vmul.f32 %v95_v43, %v1718_v41  ;;  %v98_v55 = vmul.f32 %v95_v43, %v1721_v42  ;;  %v99_v60 = vmul.f32 %v95_v43, %v1728_v45  ;;  %v368_v41 = vld [vmem:[%s2856_s2 + $0x78] sm:$0xff]  ;;  %v367_v42 = vld [vmem:[%s2856_s2 + $0x70] sm:$0xff]  ;;  %v366_v45 = vld [vmem:[%s2856_s2 + $0x68] sm:$0xff] }
  0x45   :  { %369 = vmatpush.msrb.mxu0 %v368_v41  ;;  %1452 = vmatpush.msra.mxu1 %v368_v41 }
  0x47   :  { %370 = vmatpush.msrb.mxu0 %v367_v42  ;;  %1453 = vmatpush.msra.mxu1 %v367_v42 }
  0x49   :  { %371 = vmatpush.msrb.mxu0 %v366_v45  ;;  %1454 = vmatpush.msra.mxu1 %v366_v45 }
  0x4a   :  { %545 = vperm.xlu2 %1484, %v519_v5   ;;  %v363_v5 = vld [vmem:[%s2856_s2 + $0x50] sm:$0xff] }
  0x4b   :  { %555 = vperm.xlu0 %1482, %v521_v6   ;;  %550 = vperm.xlu1 %1483, %v520_v7   ;;  %v362_v7 = vld [vmem:[%s2856_s2 + $0x48] sm:$0xff] }
  0x4c   :  { %372 = vmatpush.msrb.mxu0 %v365_v0  ;;  %1455 = vmatpush.msra.mxu1 %v365_v0 }
  0x4e   :  { %373 = vmatpush.msrb.mxu0 %v364_v3  ;;  %1456 = vmatpush.msra.mxu1 %v364_v3 }
  0x50   :  { %374 = vmatpush.msrb.mxu0 %v363_v5  ;;  %1457 = vmatpush.msra.mxu1 %v363_v5 }
  0x52   :  { %1377 = vperm.xlu2 %1484, %v1371_v16   ;;  %375 = vmatpush.msrb.mxu0 %v362_v7  ;;  %v359_v16 = vld [vmem:[%s2856_s2 + $0x30] sm:$0xff] }
  0x53   :  { %540 = vperm.xlu0 %1482, %v518_v19   ;;  %535 = vperm.xlu1 %1483, %v517_v20   ;;  %v358_v19 = vld [vmem:[%s2856_s2 + $0x28] sm:$0xff] }
  0x54   :  { %1458 = vmatpush.msra.mxu1 %v362_v7  ;;  %376 = vmatpush.msrb.mxu0 %v361_v9 }
  0x56   :  { %1459 = vmatpush.msra.mxu1 %v361_v9  ;;  %377 = vmatpush.msrb.mxu0 %v360_v14 }
  0x58   :  { %1460 = vmatpush.msra.mxu1 %v360_v14  ;;  %378 = vmatpush.msrb.mxu0 %v359_v16 }
  0x5a   :  { %1392 = vperm.xlu2 %1484, %v1374_v26   ;;  %1461 = vmatpush.msra.mxu1 %v359_v16 }
  0x5b   :  { %1382 = vperm.xlu0 %1482, %v1372_v28   ;;  %1387 = vperm.xlu1 %1483, %v1373_v29  }
  0x5c   :  { %v113_v53 = vpop.permute.xlu2 %112  ;;  %379 = vmatpush.msrb.mxu0 %v358_v19  ;;  %1462 = vmatpush.msra.mxu1 %v358_v19 }
  0x5d   :  { %v122_v57 = vmul.f32 %v113_v53, %v98_v55 }
  0x5e   :  { %380 = vmatpush.msrb.mxu0 %v357_v22  ;;  %1463 = vmatpush.msra.mxu1 %v357_v22 }
  0x60   :  { %381 = vmatpush.msrb.mxu0 %v356_v27  ;;  %1464 = vmatpush.msra.mxu1 %v356_v27 }
  0x62   :  { %382 = vmatpush.msrb.mxu0 %v355_v31  ;;  %1465 = vmatpush.msra.mxu1 %v355_v31 }
  0x64   :  { %v137_v58 = vpop.permute.xlu2 %136  ;;  %383 = vmatpush.msrb.mxu0 %v354_v36  ;;  %1466 = vmatpush.msra.mxu1 %v354_v36 }
  0x65   :  { %v146_v59 = vadd.f32 %v137_v58, %v122_v57 }
  0x66   :  { %384 = vmatpush.msrb.mxu0 %v353_v37  ;;  %1467 = vmatpush.msra.mxu1 %v353_v37 }
  0x75   :  { %v103_v44 = vpop.permute.xlu0 %102  ;;  %v108_v47 = vpop.permute.xlu1 %107 }
  0x76   :  { %v120_v48 = vmul.f32 %v103_v44, %v96_v46  ;;  %v121_v52 = vmul.f32 %v108_v47, %v97_v50 }
  0x7d   :  { %v127_v49 = vpop.permute.xlu0 %126  ;;  %v132_v54 = vpop.permute.xlu1 %131 }
  0x7e   :  { %v144_v51 = vadd.f32 %v127_v49, %v120_v48  ;;  %v145_v56 = vadd.f32 %v132_v54, %v121_v52 }
  0x80   :  { %180 = vmatmul.f32.vlgmr.msra.gmra.mxu0 %v144_v51 }
  0x85   :  { %v118_v40 = vpop.permute.xlu0 %117  ;;  %v142_v62 = vpop.permute.xlu1 %141 }
  0x86   :  { %v123_v61 = vmul.f32 %v118_v40, %v99_v60 }
  0x88   :  { %183 = vmatmul.f32.gmra.mxu0 %v145_v56  ;;  %v147_v63 = vadd.f32 %v142_v62, %v123_v61 }
  0x90   :  { %186 = vmatmul.f32.gmra.mxu0 %v146_v59 }
  0x98   :  { %189 = vmatmul.f32.gmra.mxu0 %v147_v63 }
  0xfd   :  { %v1853_v1 = vpop.f32.mrf.mxu0 }
  0xfe   :  { %v1856_v2 = vmul.f32 0.70710677, %v1853_v1 }
 0x100   :  { %v1862_v4 = vand.u32 2147483647, %v1856_v2  ;;  %vm333_vm2 = vcmp.ge.f32.partialorder %v1856_v2, 0.0 }
 0x102   :  { %v205_v6 = vmul.f32 0.3275911, %v1862_v4  ;;  %v309_v47 = vsub.f32 0.0, %v1862_v4 }
 0x104   :  { %v209_v8 = vadd.f32 1.0, %v205_v6  ;;  %v313_v55 = vmul.f32 %v309_v47, %v1862_v4 }
 0x105   :  { %v1874_v12 = vpop.f32.mrf.mxu0 }
 0x106   :  { %1489 = vrcp.f32 %v209_v8  ;;  %v1880_v15 = vmul.f32 0.70710677, %v1874_v12  ;;  %v224_v29 = vand.u32 2147483648, %v209_v8  ;;  %v222_v33 = vand.u32 2147483647, %v209_v8 }
 0x107   :  { %vm218_vm5 = vweird.f32 %v209_v8  ;;  %v317_v45 = vmul.f32 1.442695, %v313_v55 }
 0x108   :  { %v1886_v18 = vand.u32 2147483647, %v1880_v15  ;;  %v225_v39 = vor.u32 1.1754944e-38, %v224_v29  ;;  %vm223_vm7 = vcmp.eq.f32.partialorder %v222_v33, 8.507059e+37 }
 0x10a   :  { %v206_v20 = vmul.f32 0.3275911, %v1886_v18  ;;  %v310_v7 = vsub.f32 0.0, %v1886_v18 }
 0x10c   :  { %v1490_v21 = vpop.eup %1489  ;;  %v210_v24 = vadd.f32 1.0, %v206_v20 }
 0x10d   :  { %v214_v23 = vmul.f32 %v1490_v21, %v209_v8  ;;  %v1895_v25 = vpop.f32.mrf.mxu0  ;;  %vm219_vm4 = vweird.f32 %v1490_v21 }
 0x10e   :  { %v1898_v26 = vmul.f32 0.70710677, %v1895_v25  ;;  %1491 = vrcp.f32 %v210_v24  ;;  %vm220_vm6 = vmor %vm218_vm5, %vm219_vm4  ;;  %v239_v56 = vand.u32 2147483648, %v210_v24  ;;  %v237_v59 = vand.u32 2147483647, %v210_v24 }
 0x10f   :  { %v215_v28 = vsub.f32 1.0, %v214_v23  ;;  %vm233_vm9 = vweird.f32 %v210_v24  ;;  %v314_v23 = vmul.f32 %v310_v7, %v1886_v18  ;;  %vm334_vm5 = vcmp.ge.f32.partialorder %v1880_v15, 0.0 }
 0x110   :  { %v1904_v30 = vand.u32 2147483647, %v1898_v26  ;;  %v240_v42 = vor.u32 1.1754944e-38, %v239_v56  ;;  %vm238_vm11 = vcmp.eq.f32.partialorder %v237_v59, 8.507059e+37  ;;  %v195_v15 = vmul.f32 0.5, %v1895_v25 }
 0x111   :  { %v216_v32 = vmul.f32 %v1490_v21, %v215_v28 }
 0x112   :  { %v207_v34 = vmul.f32 0.3275911, %v1904_v30 }
 0x113   :  { %v217_v38 = vadd.f32 %v1490_v21, %v216_v32  ;;  %v311_v32 = vsub.f32 0.0, %v1904_v30 }
 0x114   :  { %v211_v43 = vadd.f32 1.0, %v207_v34  ;;  %v1492_v44 = vpop.eup %1491 }
 0x115   :  { %v221_v46 = vsel %vm220_vm6, %v1490_v21, %v217_v38  ;;  %v1917_v48 = vpop.f32.mrf.mxu0  ;;  %v229_v50 = vmul.f32 %v1492_v44, %v210_v24  ;;  %vm234_vm8 = vweird.f32 %v1492_v44  ;;  %vm335_vm6 = vcmp.ge.f32.partialorder %v1898_v26, 0.0 }
 0x116   :  { %v226_v49 = vsel %vm223_vm7, %v225_v39, %v221_v46  ;;  %1493 = vrcp.f32 %v211_v43  ;;  %v1920_v53 = vmul.f32 0.70710677, %v1917_v48  ;;  %vm235_vm10 = vmor %vm233_vm9, %vm234_vm8  ;;  %v254_v8 = vand.u32 2147483648, %v211_v43 }
 0x117   :  { %v273_v51 = vmul.f32 1.0614054, %v226_v49  ;;  %v230_v52 = vsub.f32 1.0, %v229_v50  ;;  %v252_v9 = vand.u32 2147483647, %v211_v43  ;;  %vm248_vm13 = vweird.f32 %v211_v43 }
 0x118   :  { %v1924_v58 = vand.u32 2147483647, %v1920_v53  ;;  %v255_v24 = vor.u32 1.1754944e-38, %v254_v8  ;;  %v315_v50 = vmul.f32 %v311_v32, %v1904_v30  ;;  %vm336_vm7 = vcmp.ge.f32.partialorder %v1920_v53, 0.0 }
 0x119   :  { %v277_v54 = vadd.f32 -1.4531521, %v273_v51  ;;  %v231_v57 = vmul.f32 %v1492_v44, %v230_v52  ;;  %vm253_vm15 = vcmp.eq.f32.partialorder %v252_v9, 8.507059e+37 }
 0x11a   :  { %v208_v61 = vmul.f32 0.3275911, %v1924_v58 }
 0x11b   :  { %v281_v60 = vmul.f32 %v277_v54, %v226_v49  ;;  %v232_v62 = vadd.f32 %v1492_v44, %v231_v57 }
 0x11c   :  { %v1494_v40 = vpop.eup %1493  ;;  %v212_v0 = vadd.f32 1.0, %v208_v61  ;;  %v321_v61 = vmul.f32 1.442695, %v315_v50 }
 0x11d   :  { %v285_v63 = vadd.f32 1.4214138, %v281_v60  ;;  %v244_v41 = vmul.f32 %v1494_v40, %v211_v43  ;;  %v236_v3 = vsel %vm235_vm10, %v1492_v44, %v232_v62  ;;  %vm249_vm12 = vweird.f32 %v1494_v40 }
 0x11e   :  { %v241_v6 = vsel %vm238_vm11, %v240_v42, %v236_v3  ;;  %1495 = vrcp.f32 %v212_v0  ;;  %vm250_vm14 = vmor %vm248_vm13, %vm249_vm12  ;;  %v319_v43 = vmul.f32 1.442695, %v314_v23  ;;  %v269_v51 = vand.u32 2147483648, %v212_v0 }
 0x11f   :  { %v289_v4 = vmul.f32 %v285_v63, %v226_v49  ;;  %v245_v5 = vsub.f32 1.0, %v244_v41  ;;  %v274_v19 = vmul.f32 1.0614054, %v241_v6  ;;  %1497 = vpow2.f32 %v317_v45 }
 0x120   :  { %v267_v52 = vand.u32 2147483647, %v212_v0  ;;  %1499 = vpow2.f32 %v319_v43  ;;  %vm263_vm1 = vweird.f32 %v212_v0  ;;  %v270_v62 = vor.u32 1.1754944e-38, %v269_v51 }
 0x121   :  { %v293_v14 = vadd.f32 -0.28449672, %v289_v4  ;;  %v246_v16 = vmul.f32 %v1494_v40, %v245_v5  ;;  %v278_v21 = vadd.f32 -1.4531521, %v274_v19  ;;  %v193_v45 = vmul.f32 0.5, %v1853_v1 }
 0x122   :  { %vm268_vm4 = vcmp.eq.f32.partialorder %v267_v52, 8.507059e+37  ;;  %v312_v4 = vsub.f32 0.0, %v1924_v58  ;;  %1501 = vpow2.f32 %v321_v61  ;;  %vm613_vm11 = vcmask 261120  }
 0x123   :  { %v297_v20 = vmul.f32 %v293_v14, %v226_v49  ;;  %v247_v22 = vadd.f32 %v1494_v40, %v246_v16  ;;  %v282_v28 = vmul.f32 %v278_v21, %v241_v6 }
 0x124   :  { %v1496_v31 = vpop.eup %1495 }
 0x125   :  { %v301_v27 = vadd.f32 0.2548296, %v297_v20  ;;  %v251_v29 = vsel %vm250_vm14, %v1494_v40, %v247_v22  ;;  %v259_v36 = vmul.f32 %v1496_v31, %v212_v0  ;;  %v286_v37 = vadd.f32 1.4214138, %v282_v28  ;;  %v1498_v39 = vpop.eup %1497 }
 0x126   :  { %v256_v33 = vsel %vm253_vm15, %v255_v24, %v251_v29  ;;  %vm264_vm0 = vweird.f32 %v1496_v31  ;;  %v1500_v9 = vpop.eup %1499  ;;  %v316_v20 = vmul.f32 %v312_v4, %v1924_v58 }
 0x127   :  { %v305_v34 = vmul.f32 %v301_v27, %v226_v49  ;;  %v275_v38 = vmul.f32 1.0614054, %v256_v33  ;;  %v260_v46 = vsub.f32 1.0, %v259_v36  ;;  %v290_v47 = vmul.f32 %v286_v37, %v241_v6  ;;  %vm265_vm3 = vmor %vm263_vm1, %vm264_vm0 }
 0x128   :  { %v1502_v28 = vpop.eup %1501 }
 0x129   :  { %v325_v44 = vmul.f32 %v1498_v39, %v305_v34  ;;  %v279_v18 = vadd.f32 -1.4531521, %v275_v38  ;;  %v261_v55 = vmul.f32 %v1496_v31, %v260_v46  ;;  %v294_v56 = vadd.f32 -0.28449672, %v290_v47 }
 0x12a   :  { %v194_v34 = vmul.f32 0.5, %v1874_v12 }
 0x12b   :  { %v329_v54 = vsub.f32 1.0, %v325_v44  ;;  %v283_v57 = vmul.f32 %v279_v18, %v256_v33  ;;  %v298_v59 = vmul.f32 %v294_v56, %v241_v6  ;;  %v262_v40 = vadd.f32 %v1496_v31, %v261_v55 }
 0x12c   :  { %v196_v55 = vmul.f32 0.5, %v1917_v48 }
 0x12d   :  { %v337_v49 = vsub.f32 0.0, %v329_v54  ;;  %v287_v60 = vadd.f32 1.4214138, %v283_v57  ;;  %v302_v63 = vadd.f32 0.2548296, %v298_v59  ;;  %v266_v42 = vsel %vm265_vm3, %v1496_v31, %v262_v40 }
 0x12e   :  { %v271_v0 = vsel %vm268_vm4, %v270_v62, %v266_v42 }
 0x12f   :  { %v341_v30 = vsel %vm333_vm2, %v329_v54, %v337_v49  ;;  %v291_v41 = vmul.f32 %v287_v60, %v256_v33  ;;  %v306_v5 = vmul.f32 %v302_v63, %v241_v6  ;;  %v276_v8 = vmul.f32 1.0614054, %v271_v0 }
 0x130   :  { %v345_v3 = vadd.f32 1.0, %v341_v30  ;;  %v323_v6 = vmul.f32 1.442695, %v316_v20 }
 0x131   :  { %v295_v7 = vadd.f32 -0.28449672, %v291_v41  ;;  %v326_v2 = vmul.f32 %v1500_v9, %v306_v5  ;;  %v280_v19 = vadd.f32 -1.4531521, %v276_v8 }
 0x132   :  { %v349_v14 = vmul.f32 %v345_v3, %v193_v45  ;;  %1503 = vpow2.f32 %v323_v6 }
 0x133   :  { %v299_v16 = vmul.f32 %v295_v7, %v256_v33  ;;  %v330_v21 = vsub.f32 1.0, %v326_v2  ;;  %v284_v23 = vmul.f32 %v280_v19, %v271_v0 }
 0x134   :  { %385 = vmatmul.f32.vlgmr.msrb.gmra.mxu0 %v349_v14 }
 0x135   :  { %v303_v22 = vadd.f32 0.2548296, %v299_v16  ;;  %v338_v1 = vsub.f32 0.0, %v330_v21  ;;  %v288_v27 = vadd.f32 1.4214138, %v284_v23 }
 0x137   :  { %v307_v24 = vmul.f32 %v303_v22, %v256_v33  ;;  %v342_v29 = vsel %vm334_vm5, %v330_v21, %v338_v1  ;;  %v292_v32 = vmul.f32 %v288_v27, %v271_v0 }
 0x138   :  { %v346_v36 = vadd.f32 1.0, %v342_v29  ;;  %v1504_v18 = vpop.eup %1503  ;;  %v466_v29 = vpop.permute.xlu0 %465 }
 0x139   :  { %v327_v31 = vmul.f32 %v1502_v28, %v307_v24  ;;  %v296_v38 = vadd.f32 -0.28449672, %v292_v32  ;;  %v471_v28 = vpop.permute.xlu2 %470 }
 0x13a   :  { %v350_v58 = vmul.f32 %v346_v36, %v194_v34  ;;  %v495_v36 = vpop.permute.xlu1 %494 }
 0x13b   :  { %v331_v37 = vsub.f32 1.0, %v327_v31  ;;  %v300_v43 = vmul.f32 %v296_v38, %v271_v0 }
 0x13c   :  { %388 = vmatmul.f32.vlgmr.msra.gmra.mxu1 %v350_v58 }
 0x13d   :  { %v339_v39 = vsub.f32 0.0, %v331_v37  ;;  %v304_v44 = vadd.f32 0.2548296, %v300_v43 }
 0x13f   :  { %v343_v33 = vsel %vm335_vm6, %v331_v37, %v339_v39  ;;  %v308_v47 = vmul.f32 %v304_v44, %v271_v0 }
 0x140   :  { %v347_v46 = vadd.f32 1.0, %v343_v33  ;;  %v490_v39 = vpop.permute.xlu0 %489 }
 0x141   :  { %v328_v51 = vmul.f32 %v1504_v18, %v308_v47  ;;  %v461_v38 = vpop.permute.xlu2 %460 }
 0x142   :  { %v351_v50 = vmul.f32 %v347_v46, %v195_v15 }
 0x143   :  { %v332_v12 = vsub.f32 1.0, %v328_v51  ;;  %v456_v51 = vpop.permute.xlu1 %455 }
 0x144   :  { %391 = vmatmul.f32.gmra.mxu1 %v351_v50 }
 0x145   :  { %v340_v52 = vsub.f32 0.0, %v332_v12 }
 0x147   :  { %v344_v54 = vsel %vm336_vm7, %v332_v12, %v340_v52 }
 0x148   :  { %v348_v56 = vadd.f32 1.0, %v344_v54 }
 0x149   :  { %v485_v54 = vpop.permute.xlu2 %484 }
 0x14a   :  { %v352_v26 = vmul.f32 %v348_v56, %v196_v55  ;;  %v480_v56 = vpop.permute.xlu0 %479 }
 0x14c   :  { %394 = vmatmul.f32.gmra.mxu1 %v352_v26 }
 0x1b1   :  { %v386_v59 = vpop.f32.mrf.mxu0 }
 0x1b2   :  { %v1945_v60 = vadd.f32 %v386_v59, %v1663_v10  ;;  %v505_v59 = vld [vmem:[%s2857_s3 + $0x20] sm:$0xff] }
 0x1b4   :  { %2899 = vst [vmem:[#allocation3_spill] sm:$0xff] %v1945_v60 }
 0x1b9   :  { %v389_v57 = vpop.f32.mrf.mxu1 }
 0x1ba   :  { %v1942_v25 = vadd.f32 %v389_v57, %v1668_v11  ;;  %v501_v57 = vld [vmem:[%s2857_s3] sm:$0xff] }
 0x1bc   :  { %2898 = vst [vmem:[#allocation2_spill] sm:$0xff] %v1942_v25  ;;  %v410_v53 = vadd.f32 %v1942_v25, %v1945_v60 }
 0x1c1   :  { %v392_v49 = vpop.f32.mrf.mxu1 }
 0x1c2   :  { %v1948_v40 = vadd.f32 %v392_v49, %v1675_v13  ;;  %v502_v49 = vld [vmem:[%s2857_s3 + $0x8] sm:$0xff] }
 0x1c4   :  { %2900 = vst [vmem:[#allocation4_spill] sm:$0xff] %v1948_v40  ;;  %v411_v48 = vadd.f32 %v410_v53, %v1948_v40  ;;  %v514_v53 = vld [vmem:[%s2857_s3 + $0x68] sm:$0xff] }
 0x1c9   :  { %v395_v61 = vpop.f32.mrf.mxu1 }
 0x1ca   :  { %v1954_v62 = vadd.f32 %v395_v61, %v1684_v17  ;;  %v503_v61 = vld [vmem:[%s2857_s3 + $0x10] sm:$0xff] }
 0x1cc   :  { %2901 = vst [vmem:[#allocation5_spill] sm:$0xff] %v1954_v62  ;;  %v412_v30 = vadd.f32 %v411_v48, %v1954_v62  ;;  %v506_v48 = vld [vmem:[%s2857_s3 + $0x28] sm:$0xff] }
 0x1ce   :  { %v413_v63 = vrot.slane %v412_v30, 4 }
 0x1d0   :  { %v414_v11 = vadd.f32 %v413_v63, %v412_v30  ;;  %v515_v30 = vld [vmem:[%s2857_s3 + $0x70] sm:$0xff]  ;;  %v504_v63 = vld [vmem:[%s2857_s3 + $0x18] sm:$0xff] }
 0x1d2   :  { %v415_v41 = vrot.slane %v414_v11, 2 }
 0x1d4   :  { %v416_v42 = vadd.f32 %v415_v41, %v414_v11  ;;  %v507_v11 = vld [vmem:[%s2857_s3 + $0x30] sm:$0xff]  ;;  %v516_v41 = vld [vmem:[%s2857_s3 + $0x78] sm:$0xff] }
 0x1d6   :  { %v417_v10 = vrot.slane %v416_v42, 1 }
 0x1d8   :  { %v418_v45 = vadd.f32 %v417_v10, %v416_v42  ;;  %v508_v42 = vld [vmem:[%s2857_s3 + $0x38] sm:$0xff]  ;;  %v509_v10 = vld [vmem:[%s2857_s3 + $0x40] sm:$0xff] }
 0x1da   :  { %v419_v13 = vmul.f32 %v418_v45, %v1702_v35  ;;  %v510_v45 = vld [vmem:[%s2857_s3 + $0x48] sm:$0xff] }
 0x1dc   :  { %v420_v3 = vsub.f32 %v1945_v60, %v419_v13  ;;  %v421_v4 = vsub.f32 %v1942_v25, %v419_v13  ;;  %v422_v0 = vsub.f32 %v1948_v40, %v419_v13  ;;  %v423_v5 = vsub.f32 %v1954_v62, %v419_v13  ;;  %v511_v13 = vld [vmem:[%s2857_s3 + $0x50] sm:$0xff] }
 0x1de   :  { %v424_v17 = vmul.f32 %v420_v3, %v420_v3  ;;  %v425_v7 = vmul.f32 %v421_v4, %v421_v4  ;;  %v426_v8 = vmul.f32 %v422_v0, %v422_v0  ;;  %v427_v14 = vmul.f32 %v423_v5, %v423_v5 }
 0x1e0   :  { %v428_v9 = vadd.f32 %v425_v7, %v424_v17 }
 0x1e2   :  { %v429_v2 = vadd.f32 %v428_v9, %v426_v8  ;;  %v606_v9 = vpop.permute.xlu2 %605 }
 0x1e4   :  { %v430_v16 = vadd.f32 %v429_v2, %v427_v14 }
 0x1e6   :  { %v431_v19 = vrot.slane %v430_v16, 4 }
 0x1e8   :  { %v432_v20 = vadd.f32 %v431_v19, %v430_v16 }
 0x1ea   :  { %v433_v21 = vrot.slane %v432_v20, 2  ;;  %v2039_v16 = vpop.permute.xlu2 %590 }
 0x1ec   :  { %v434_v22 = vadd.f32 %v433_v21, %v432_v20 }
 0x1ee   :  { %v435_v23 = vrot.slane %v434_v22, 1 }
 0x1f0   :  { %v436_v1 = vadd.f32 %v435_v23, %v434_v22 }
 0x1f2   :  { %v437_v24 = vmul.f32 %v436_v1, %v1702_v35  ;;  %v2041_v21 = vpop.permute.xlu2 %575 }
 0x1f4   :  { %v438_v27 = vadd.f32 1e-05, %v437_v24 }
 0x1f6   :  { %1505 = vrsqrt.f32 %v438_v27  ;;  %vm445_vm9 = vweird.f32 %v438_v27 }
 0x1fc   :  { %v1506_v6 = vpop.eup %1505 }
 0x1fd   :  { %v440_v31 = vmul.f32 %v1506_v6, %v438_v27  ;;  %vm446_vm8 = vweird.f32 %v1506_v6 }
 0x1fe   :  { %vm447_vm10 = vmor %vm445_vm9, %vm446_vm8 }
 0x1ff   :  { %v441_v32 = vmul.f32 %v1506_v6, %v440_v31 }
 0x201   :  { %v442_v34 = vmul.f32 0.5, %v441_v32 }
 0x203   :  { %v443_v37 = vsub.f32 1.5, %v442_v34 }
 0x205   :  { %v444_v58 = vmul.f32 %v1506_v6, %v443_v37 }
 0x207   :  { %v448_v43 = vsel %vm447_vm10, %v1506_v6, %v444_v58  ;;  %v561_v6 = vpop.permute.xlu2 %560 }
 0x208   :  { %v452_v33 = vmul.f32 %v448_v43, %v423_v5  ;;  %v451_v44 = vmul.f32 %v448_v43, %v422_v0  ;;  %v450_v35 = vmul.f32 %v448_v43, %v421_v4  ;;  %v449_v47 = vmul.f32 %v448_v43, %v420_v3  ;;  %v512_v3 = vld [vmem:[%s2857_s3 + $0x58] sm:$0xff]  ;;  %v513_v4 = vld [vmem:[%s2857_s3 + $0x60] sm:$0xff]  ;;  %v2027_v0 = vpop.permute.xlu1 %610  ;;  %v601_v5 = vpop.permute.xlu0 %600 }
 0x20a   :  { %v476_v15 = vmul.f32 %v471_v28, %v452_v33  ;;  %v475_v46 = vmul.f32 %v466_v29, %v451_v44  ;;  %v474_v50 = vmul.f32 %v461_v38, %v450_v35  ;;  %v473_v52 = vmul.f32 %v456_v51, %v449_v47 }
 0x20c   :  { %v500_v18 = vadd.f32 %v495_v36, %v476_v15  ;;  %v499_v12 = vadd.f32 %v490_v39, %v475_v46  ;;  %v498_v55 = vadd.f32 %v485_v54, %v474_v50  ;;  %v497_v26 = vadd.f32 %v480_v56, %v473_v52 }
 0x20e   :  { %674 = vmatpush.msra.mxu0 %v500_v18  ;;  %1468 = vmatpush.msrb.mxu1 %v500_v18 }
 0x20f   :  { %1469 = vmatpush.msra.mxu2 %v500_v18  ;;  %1470 = vmatpush.msra.mxu3 %v500_v18  ;;  %v546_v35 = vpop.permute.xlu2 %545 }
 0x210   :  { %675 = vmatpush.msra.mxu0 %v499_v12  ;;  %1471 = vmatpush.msrb.mxu1 %v499_v12  ;;  %v2029_v17 = vpop.permute.xlu1 %595  ;;  %v2031_v7 = vpop.permute.xlu0 %585 }
 0x211   :  { %1472 = vmatpush.msra.mxu2 %v499_v12  ;;  %1473 = vmatpush.msra.mxu3 %v499_v12 }
 0x212   :  { %676 = vmatpush.msra.mxu0 %v498_v55  ;;  %1474 = vmatpush.msrb.mxu1 %v498_v55 }
 0x213   :  { %1475 = vmatpush.msra.mxu2 %v498_v55  ;;  %1476 = vmatpush.msra.mxu3 %v498_v55 }
 0x214   :  { %677 = vmatpush.msra.mxu0 %v497_v26  ;;  %1477 = vmatpush.msrb.mxu1 %v497_v26 }
 0x215   :  { %1478 = vmatpush.msra.mxu2 %v497_v26  ;;  %1479 = vmatpush.msra.mxu3 %v497_v26 }
 0x216   :  { %1436 = vmatmul.msk.f32.vlgmr.msra.gmra.mxu0 %vm613_vm11, %v501_v57  ;;  %1437 = vmatmul.msk.f32.vlgmr.msrb.gmra.mxu1 %vm613_vm11, %v502_v49 }
 0x217   :  { %1440 = vmatmul.msk.f32.vlgmr.msra.gmra.mxu2 %vm613_vm11, %v505_v59  ;;  %1449 = vmatmul.msk.f32.vlgmr.msra.gmra.mxu3 %vm613_vm11, %v514_v53 }
 0x218   :  { %v2033_v8 = vpop.permute.xlu1 %580  ;;  %v2035_v14 = vpop.permute.xlu0 %570 }
 0x21e   :  { %1438 = vmatmul.msk.f32.gmra.mxu1 %vm613_vm11, %v503_v61 }
 0x21f   :  { %1441 = vmatmul.msk.f32.gmra.mxu2 %vm613_vm11, %v506_v48  ;;  %1450 = vmatmul.msk.f32.gmra.mxu3 %vm613_vm11, %v515_v30 }
 0x220   :  { %v2037_v2 = vpop.permute.xlu1 %565  ;;  %v556_v19 = vpop.permute.xlu0 %555 }
 0x226   :  { %1439 = vmatmul.msk.f32.gmra.mxu1 %vm613_vm11, %v504_v63 }
 0x227   :  { %1442 = vmatmul.msk.f32.gmra.mxu2 %vm613_vm11, %v507_v11  ;;  %1451 = vmatmul.msk.f32.gmra.mxu3 %vm613_vm11, %v516_v41 }
 0x228   :  { %v551_v20 = vpop.permute.xlu1 %550  ;;  %v541_v22 = vpop.permute.xlu0 %540 }
 0x22f   :  { %1443 = vmatmul.msk.f32.gmra.mxu2 %vm613_vm11, %v508_v42 }
 0x230   :  { %v536_v23 = vpop.permute.xlu1 %535 }
 0x237   :  { %1444 = vmatmul.msk.f32.gmra.mxu2 %vm613_vm11, %v509_v10 }
 0x23f   :  { %1445 = vmatmul.msk.f32.gmra.mxu2 %vm613_vm11, %v510_v45 }
 0x247   :  { %1446 = vmatmul.msk.f32.gmra.mxu2 %vm613_vm11, %v511_v13 }
 0x24f   :  { %1447 = vmatmul.msk.f32.gmra.mxu2 %vm613_vm11, %v512_v3 }
 0x257   :  { %1448 = vmatmul.msk.f32.gmra.mxu2 %vm613_vm11, %v513_v4 }
 0x293   :  { %v679_v1 = vpop.f32.mrf.mxu0  ;;  %v682_v24 = vpop.f32.mrf.mxu1 }
 0x294   :  { %v2043_v27 = vadd.f32 %v679_v1, %v536_v23  ;;  %v2045_v28 = vadd.f32 %v682_v24, %v541_v22 }
 0x296   :  { %2902 = vst [vmem:[#allocation6_spill] sm:$0xff] %v2043_v27  ;;  %v2048_v29 = vmul.f32 0.70710677, %v2043_v27  ;;  %v2051_v31 = vmul.f32 0.70710677, %v2045_v28 }
 0x297   :  { %2903 = vst [vmem:[#allocation7_spill] sm:$0xff] %v2045_v28 }
 0x298   :  { %2904 = vst [vmem:[#allocation8_spill] sm:$0xff] %v2048_v29  ;;  %v2054_v32 = vand.u32 2147483647, %v2048_v29  ;;  %v2061_v58 = vand.u32 2147483647, %v2051_v31 }
 0x299   :  { %2905 = vst [vmem:[#allocation9_spill] sm:$0xff] %v2051_v31 }
 0x29a   :  { %2906 = vst [vmem:[#allocation10_spill] sm:$0xff] %v2054_v32  ;;  %v691_v34 = vpop.f32.mrf.mxu2  ;;  %v718_v36 = vpop.f32.mrf.mxu3  ;;  %v775_v44 = vmul.f32 0.3275911, %v2054_v32  ;;  %v776_v46 = vmul.f32 0.3275911, %v2061_v58 }
 0x29b   :  { %v2056_v37 = vadd.f32 %v691_v34, %v556_v19  ;;  %v2058_v38 = vadd.f32 %v718_v36, %v601_v5  ;;  %2908 = vst [vmem:[#allocation12_spill] sm:$0xff] %v2061_v58  ;;  %v685_v33 = vpop.f32.mrf.mxu1 }
 0x29c   :  { %v2073_v18 = vadd.f32 %v685_v33, %v546_v35  ;;  %v2075_v50 = vadd.f32 1.0, %v775_v44  ;;  %v2080_v56 = vadd.f32 1.0, %v776_v46 }
 0x29d   :  { %2907 = vst [vmem:[#allocation11_spill] sm:$0xff] %v2056_v37  ;;  %v2064_v39 = vmul.f32 0.70710677, %v2056_v37  ;;  %v2067_v43 = vmul.f32 0.70710677, %v2058_v38 }
 0x29e   :  { %2910 = vst [vmem:[#allocation14_spill] sm:$0xff] %v2073_v18  ;;  %v2078_v12 = vmul.f32 0.70710677, %v2073_v18  ;;  %1507 = vrcp.f32 %v2075_v50 }
 0x29f   :  { %2909 = vst [vmem:[#allocation13_spill] sm:$0xff] %v2064_v39  ;;  %v763_v15 = vand.u32 2147483647, %v2064_v39  ;;  %v772_v47 = vand.u32 2147483647, %v2067_v43  ;;  %1509 = vrcp.f32 %v2080_v56 }
 0x2a0   :  { %2911 = vst [vmem:[#allocation15_spill] sm:$0xff] %v2075_v50  ;;  %v2085_v49 = vand.u32 2147483647, %v2078_v12 }
 0x2a1   :  { %v779_v51 = vmul.f32 0.3275911, %v763_v15  ;;  %2912 = vst [vmem:[#allocation16_spill] sm:$0xff] %v2078_v12  ;;  %v788_v54 = vmul.f32 0.3275911, %v772_v47  ;;  %v1195_v26 = vsub.f32 0.0, %v763_v15 }
 0x2a2   :  { %v694_v52 = vpop.f32.mrf.mxu2  ;;  %v721_v55 = vpop.f32.mrf.mxu3  ;;  %2913 = vst [vmem:[#allocation17_spill] sm:$0xff] %v2080_v56  ;;  %v777_v11 = vmul.f32 0.3275911, %v2085_v49  ;;  %v1204_v41 = vsub.f32 0.0, %v772_v47 }
 0x2a3   :  { %v2082_v57 = vadd.f32 %v694_v52, %v561_v6  ;;  %v2088_v59 = vadd.f32 1.0, %v779_v51  ;;  %v2090_v53 = vadd.f32 %v721_v55, %v606_v9  ;;  %v2092_v61 = vadd.f32 1.0, %v788_v54  ;;  %v688_v63 = vpop.f32.mrf.mxu1 }
 0x2a4   :  { %v1211_v48 = vmul.f32 %v1195_v26, %v763_v15  ;;  %v2105_v13 = vadd.f32 %v688_v63, %v551_v20  ;;  %v2107_v3 = vpop.eup %1507  ;;  %v2110_v19 = vadd.f32 1.0, %v777_v11  ;;  %v1220_v23 = vmul.f32 %v1204_v41, %v772_v47 }
 0x2a5   :  { %2914 = vst [vmem:[#allocation18_spill] sm:$0xff] %v2082_v57  ;;  %v2096_v30 = vmul.f32 0.70710677, %v2082_v57  ;;  %1511 = vrcp.f32 %v2088_v59  ;;  %v2102_v10 = vmul.f32 0.70710677, %v2090_v53  ;;  %v2112_v22 = vpop.eup %1509  ;;  %v808_v6 = vmul.f32 %v2107_v3, %v2075_v50 }
 0x2a6   :  { %1513 = vrcp.f32 %v2092_v61  ;;  %2916 = vst [vmem:[#allocation20_spill] sm:$0xff] %v2105_v13  ;;  %v1231_v4 = vmul.f32 1.442695, %v1211_v48  ;;  %v2119_v20 = vmul.f32 0.70710677, %v2105_v13  ;;  %v823_v35 = vmul.f32 %v2112_v22, %v2080_v56 }
 0x2a7   :  { %2915 = vst [vmem:[#allocation19_spill] sm:$0xff] %v2096_v30  ;;  %v764_v42 = vand.u32 2147483647, %v2096_v30  ;;  %v773_v9 = vand.u32 2147483647, %v2102_v10  ;;  %v1193_v63 = vsub.f32 0.0, %v2085_v49  ;;  %vm1007_vm0 = vweird.f32 %v2092_v61 }
 0x2a8   :  { %2917 = vst [vmem:[#allocation21_spill] sm:$0xff] %v2107_v3  ;;  %1515 = vpow2.f32 %v1231_v4  ;;  %v762_v46 = vand.u32 2147483647, %v2119_v20  ;;  %v1249_v51 = vmul.f32 1.442695, %v1220_v23  ;;  %vm1301_vm8 = vcmp.ge.f32.partialorder %v2102_v10, 0.0 }
 0x2a9   :  { %v780_v5 = vmul.f32 0.3275911, %v764_v42  ;;  %2918 = vst [vmem:[#allocation22_spill] sm:$0xff] %v2110_v19  ;;  %v789_v24 = vmul.f32 0.3275911, %v773_v9  ;;  %v1196_v36 = vsub.f32 0.0, %v764_v42  ;;  %1517 = vrcp.f32 %v2110_v19 }
 0x2aa   :  { %v697_v45 = vpop.f32.mrf.mxu2  ;;  %2919 = vst [vmem:[#allocation23_spill] sm:$0xff] %v2112_v22  ;;  %v724_v52 = vpop.f32.mrf.mxu3  ;;  %v778_v26 = vmul.f32 0.3275911, %v762_v46  ;;  %v1205_v47 = vsub.f32 0.0, %v773_v9 }
 0x2ab   :  { %v2114_v1 = vadd.f32 1.0, %v780_v5  ;;  %2920 = vst [vmem:[#allocation24_spill] sm:$0xff] %v2119_v20  ;;  %v2121_v34 = vpop.eup %1511  ;;  %v2124_v33 = vadd.f32 %v697_v45, %v2037_v2  ;;  %v2131_v15 = vadd.f32 1.0, %v789_v24  ;;  %v809_v2 = vsub.f32 1.0, %v808_v6 }
 0x2ac   :  { %2921 = vst [vmem:[#allocation25_spill] sm:$0xff] %v2121_v34  ;;  %v2126_v44 = vpop.eup %1513  ;;  %v868_v55 = vmul.f32 %v2121_v34, %v2088_v59  ;;  %v1212_v11 = vmul.f32 %v1196_v36, %v764_v42  ;;  %v824_v45 = vsub.f32 1.0, %v823_v35  ;;  %v2145_v4 = vadd.f32 1.0, %v778_v26 }
 0x2ad   :  { %1519 = vrcp.f32 %v2114_v1  ;;  %v1003_v48 = vmul.f32 %v2126_v44, %v2092_v61  ;;  %v2143_v41 = vmul.f32 0.70710677, %v2124_v33  ;;  %v2148_v5 = vadd.f32 %v724_v52, %v2027_v0 }
 0x2ae   :  { %1521 = vrcp.f32 %v2131_v15  ;;  %v2153_v24 = vpop.eup %1515  ;;  %v2160_v35 = vmul.f32 %v2107_v3, %v809_v2  ;;  %v869_v26 = vsub.f32 1.0, %v868_v55  ;;  %v2163_v0 = vmul.f32 0.5, %v2058_v38 }
 0x2af   :  { %2922 = vst [vmem:[#allocation26_spill] sm:$0xff] %v2143_v41  ;;  %1523 = vpow2.f32 %v1249_v51  ;;  %v765_v42 = vand.u32 2147483647, %v2143_v41  ;;  %v2157_v36 = vpop.eup %1517  ;;  %v1004_v52 = vsub.f32 1.0, %v1003_v48  ;;  %v1233_v51 = vmul.f32 1.442695, %v1212_v11 }
 0x2b0   :  { %2923 = vst [vmem:[#allocation27_spill] sm:$0xff] %v2153_v24  ;;  %1525 = vrcp.f32 %v2145_v4  ;;  %v2174_v40 = vmul.f32 %v2112_v22, %v824_v45  ;;  %v2177_v2 = vmul.f32 0.5, %v2090_v53  ;;  %v2180_v38 = vmul.f32 0.70710677, %v2148_v5 }
 0x2b1   :  { %2924 = vst [vmem:[#allocation28_spill] sm:$0xff] %v2157_v36  ;;  %v781_v6 = vmul.f32 0.3275911, %v765_v42  ;;  %v1197_v11 = vsub.f32 0.0, %v765_v42  ;;  %v2190_v45 = vmul.f32 %v2121_v34, %v869_v26  ;;  %v1194_v53 = vsub.f32 0.0, %v762_v46 }
 0x2b2   :  { %v700_v54 = vpop.f32.mrf.mxu2  ;;  %2925 = vst [vmem:[#allocation29_spill] sm:$0xff] %v2160_v35  ;;  %v774_v60 = vand.u32 2147483647, %v2180_v38  ;;  %v2197_v28 = vmul.f32 %v2126_v44, %v1004_v52  ;;  %1527 = vpow2.f32 %v1233_v51  ;;  %v2206_v52 = vmul.f32 0.5, %v2124_v33 }
 0x2b3   :  { %v2151_v23 = vadd.f32 %v700_v54, %v2035_v14  ;;  %v2166_v14 = vpop.eup %1519  ;;  %v2169_v54 = vmul.f32 %v1193_v63, %v2085_v49  ;;  %2927 = vst [vmem:[#allocation31_spill] sm:$0xff] %v2174_v40  ;;  %v838_v49 = vmul.f32 %v2157_v36, %v2110_v19  ;;  %v1221_v63 = vmul.f32 %v1205_v47, %v773_v9 }
 0x2b4   :  { %v2171_v62 = vpop.eup %1521  ;;  %2928 = vst [vmem:[#allocation32_spill] sm:$0xff] %v2190_v45  ;;  %v883_v31 = vmul.f32 %v2166_v14, %v2114_v1  ;;  %v2201_v9 = vadd.f32 1.0, %v781_v6  ;;  %v790_v26 = vmul.f32 0.3275911, %v774_v60  ;;  %v1206_v18 = vsub.f32 0.0, %v774_v60 }
 0x2b5   :  { %2926 = vst [vmem:[#allocation30_spill] sm:$0xff] %v2169_v54  ;;  %v2183_v55 = vmul.f32 0.70710677, %v2151_v23  ;;  %v1018_v48 = vmul.f32 %v2171_v62, %v2131_v15  ;;  %v2194_v29 = vpop.eup %1523  ;;  %v839_v20 = vsub.f32 1.0, %v838_v49  ;;  %v1251_v37 = vmul.f32 1.442695, %v1221_v63 }
 0x2b6   :  { %v2203_v47 = vpop.eup %1525  ;;  %v1213_v57 = vmul.f32 %v1197_v11, %v765_v42  ;;  %v1210_v24 = vmul.f32 %v1194_v53, %v762_v46  ;;  %2930 = vst [vmem:[#allocation34_spill] sm:$0xff] %v2206_v52  ;;  %v2208_v30 = vadd.f32 1.0, %v790_v26  ;;  %v1026_v51 = vand.u32 2147483647, %v2131_v15 }
 0x2b7   :  { %v766_v27 = vand.u32 2147483647, %v2183_v55  ;;  %2929 = vst [vmem:[#allocation33_spill] sm:$0xff] %v2203_v47  ;;  %v1019_v39 = vsub.f32 1.0, %v1018_v48  ;;  %vm1022_vm12 = vweird.f32 %v2131_v15  ;;  %v853_v6 = vmul.f32 %v2203_v47, %v2145_v4 }
 0x2b8   :  { %1529 = vrcp.f32 %v2201_v9  ;;  %v1222_v58 = vmul.f32 %v1206_v18, %v774_v60  ;;  %v884_v48 = vsub.f32 1.0, %v883_v31  ;;  %v2219_v42 = vpop.eup %1527  ;;  %v2222_v63 = vmul.f32 %v2157_v36, %v839_v20 }
 0x2b9   :  { %v782_v12 = vmul.f32 0.3275911, %v766_v27  ;;  %v1198_v13 = vsub.f32 0.0, %v766_v27  ;;  %1531 = vrcp.f32 %v2208_v30  ;;  %2931 = vst [vmem:[#allocation35_spill] sm:$0xff] %v2219_v42  ;;  %v1020_v11 = vmul.f32 %v2171_v62, %v1019_v39 }
 0x2ba   :  { %v703_v25 = vpop.f32.mrf.mxu2  ;;  %2932 = vst [vmem:[#allocation36_spill] sm:$0xff] %v2222_v63  ;;  %1533 = vpow2.f32 %v1251_v37  ;;  %v1235_v53 = vmul.f32 1.442695, %v1213_v57  ;;  %v2225_v32 = vmul.f32 1.442695, %v1210_v24  ;;  %v2236_v18 = vmul.f32 0.5, %v2151_v23 }
 0x2bb   :  { %v704_v49 = vadd.f32 %v703_v25, %v2041_v21  ;;  %v2217_v46 = vadd.f32 1.0, %v782_v12  ;;  %v1214_v33 = vmul.f32 %v1198_v13, %v766_v27  ;;  %v2228_v25 = vmul.f32 0.5, %v2148_v5 }
 0x2bc   :  { %2933 = vst [vmem:[#allocation37_spill] sm:$0xff] %v2225_v32  ;;  %v854_v27 = vsub.f32 1.0, %v853_v6  ;;  %v1253_v31 = vmul.f32 1.442695, %v1222_v58  ;;  %vm2238_vm13 = vcmp.eq.f32.partialorder %v1026_v51, 8.507059e+37  ;;  %v2243_v37 = vmul.f32 %v2166_v14, %v884_v48 }
 0x2bd   :  { %v2230_v60 = vmul.f32 0.70710677, %v704_v49  ;;  %2934 = vst [vmem:[#allocation38_spill] sm:$0xff] %v2236_v18  ;;  %1535 = vrcp.f32 %v2217_v46  ;;  %v1237_v12 = vmul.f32 1.442695, %v1214_v33  ;;  %v1021_v58 = vadd.f32 %v2171_v62, %v1020_v11 }
 0x2be   :  { %v2247_v13 = vpop.eup %1529  ;;  %1537 = vpow2.f32 %v1235_v53  ;;  %vm1023_vm14 = vweird.f32 %v2171_v62  ;;  %vm1037_vm15 = vweird.f32 %v2208_v30  ;;  %v1028_v24 = vand.u32 2147483648, %v2131_v15 }
 0x2bf   :  { %v767_v57 = vand.u32 2147483647, %v2230_v60  ;;  %v1532_v20 = vpop.eup %1531  ;;  %v2260_v6 = vmul.f32 %v2203_v47, %v854_v27  ;;  %1539 = vpow2.f32 %v1253_v31  ;;  %v2266_v11 = vmul.f32 %v2247_v13, %v2201_v9  ;;  %vm2276_vm1 = vmor %vm1022_vm12, %vm1023_vm14 }
 0x2c0   :  { %v2256_v51 = vpop.eup %1533  ;;  %v1033_v48 = vmul.f32 %v1532_v20, %v2208_v30  ;;  %1541 = vpow2.f32 %v1237_v12  ;;  %v2268_v53 = vmul.f32 0.5, %v704_v49  ;;  %v1025_v12 = vsel %vm2276_vm1, %v2171_v62, %v1021_v58 }
 0x2c1   :  { %v783_v5 = vmul.f32 0.3275911, %v767_v57  ;;  %v1199_v23 = vsub.f32 0.0, %v767_v57  ;;  %2937 = vst [vmem:[#allocation39_spill] sm:$0xff] %v2260_v6  ;;  %v1041_v3 = vand.u32 2147483647, %v2208_v30  ;;  %vm1038_vm2 = vweird.f32 %v1532_v20 }
 0x2c2   :  { %v706_v26 = vpop.f32.mrf.mxu2  ;;  %2938 = vst [vmem:[#allocation40_spill] sm:$0xff] %v2268_v53  ;;  %v1034_v31 = vsub.f32 1.0, %v1033_v48  ;;  %v1043_v35 = vand.u32 2147483648, %v2208_v30  ;;  %v1029_v15 = vor.u32 1.1754944e-38, %v1028_v24  ;;  %v899_v27 = vsub.f32 1.0, %v2266_v11  ;;  %vm1039_vm5 = vmor %vm1037_vm15, %vm1038_vm2 }
 0x2c3   :  { %v2233_v21 = vadd.f32 %v706_v26, %v2033_v8  ;;  %v2270_v26 = vadd.f32 1.0, %v783_v5  ;;  %v2283_v49 = vpop.eup %1535  ;;  %v1215_v5 = vmul.f32 %v1199_v23, %v767_v57  ;;  %vm1008_vm3 = vweird.f32 %v2126_v44 }
 0x2c4   :  { %v2287_v52 = vpop.eup %1537  ;;  %v1035_v22 = vmul.f32 %v1532_v20, %v1034_v31  ;;  %v2296_v57 = vsel %vm2238_vm13, %v1029_v15, %v1025_v12  ;;  %v913_v23 = vmul.f32 %v2283_v49, %v2217_v46  ;;  %vm2310_vm4 = vcmp.eq.f32.partialorder %v1041_v3, 8.507059e+37  ;;  %vm2324_vm6 = vmor %vm1007_vm0, %vm1008_vm3 }
 0x2c5   :  { %v2250_v8 = vmul.f32 0.70710677, %v2233_v21  ;;  %2941 = vst [vmem:[#allocation41_spill] sm:$0xff] %v2287_v52  ;;  %1543 = vrcp.f32 %v2270_v26  ;;  %v2298_v58 = vpop.eup %1539  ;;  %v1061_v24 = vmul.f32 1.0614054, %v2296_v57  ;;  %v1044_v11 = vor.u32 1.1754944e-38, %v1043_v35 }
 0x2c6   :  { %v1013_v31 = vand.u32 2147483648, %v2092_v61  ;;  %v914_v35 = vsub.f32 1.0, %v913_v23  ;;  %vm932_vm10 = vweird.f32 %v2270_v26  ;;  %vm1302_vm12 = vcmp.ge.f32.partialorder %v2180_v38, 0.0 }
 0x2c7   :  { %v768_v33 = vand.u32 2147483647, %v2250_v8  ;;  %vm1300_vm0 = vcmp.ge.f32.partialorder %v2067_v43, 0.0 }
 0x2c8   :  { %v1014_v36 = vor.u32 1.1754944e-38, %v1013_v31 }
 0x2c9   :  { %v784_v32 = vmul.f32 0.3275911, %v768_v33  ;;  %v1200_v42 = vsub.f32 0.0, %v768_v33 }
 0x2ca   :  { %v709_v54 = vpop.f32.mrf.mxu2 }
 0x2cb   :  { %v2290_v48 = vadd.f32 1.0, %v784_v32  ;;  %v710_v40 = vadd.f32 %v709_v54, %v2031_v7  ;;  %v1216_v62 = vmul.f32 %v1200_v42, %v768_v33  ;;  %v1006_v32 = vadd.f32 %v2126_v44, %v2197_v28  ;;  %v2306_v7 = vpop.eup %1541 }
 0x2cc   :  { %2942 = vst [vmem:[#allocation42_spill] sm:$0xff] %v2306_v7  ;;  %v1036_v42 = vadd.f32 %v1532_v20, %v1035_v22  ;;  %v1239_v33 = vmul.f32 1.442695, %v1215_v5  ;;  %v1011_v28 = vand.u32 2147483647, %v2092_v61  ;;  %v2328_v30 = vpop.eup %1543  ;;  %v2331_v5 = vmul.f32 0.5, %v2233_v21 }
 0x2cd   :  { %1545 = vrcp.f32 %v2290_v48  ;;  %v2308_v54 = vmul.f32 0.70710677, %v710_v40  ;;  %v1241_v12 = vmul.f32 1.442695, %v1216_v62  ;;  %v1077_v22 = vadd.f32 -1.4531521, %v1061_v24 }
 0x2ce   :  { %v1040_v50 = vsel %vm1039_vm5, %v1532_v20, %v1036_v42  ;;  %2947 = vst [vmem:[#allocation43_spill] sm:$0xff] %v2331_v5  ;;  %v1010_v20 = vsel %vm2324_vm6, %v2126_v44, %v1006_v32  ;;  %1547 = vpow2.f32 %v1239_v33  ;;  %vm1012_vm7 = vcmp.eq.f32.partialorder %v1011_v28, 8.507059e+37 }
 0x2cf   :  { %v769_v15 = vand.u32 2147483647, %v2308_v54  ;;  %v2335_v62 = vsel %vm2310_vm4, %v1044_v11, %v1040_v50  ;;  %v1093_v23 = vmul.f32 %v1077_v22, %v2296_v57  ;;  %v928_v50 = vmul.f32 %v2328_v30, %v2270_v26 }
 0x2d0   :  { %v1062_v24 = vmul.f32 1.0614054, %v2335_v62  ;;  %1549 = vpow2.f32 %v1241_v12  ;;  %v2349_v44 = vsel %vm1012_vm7, %v1014_v36, %v1010_v20  ;;  %v2356_v33 = vmul.f32 %v2247_v13, %v899_v27 }
 0x2d1   :  { %v785_v61 = vmul.f32 0.3275911, %v769_v15  ;;  %v1201_v21 = vsub.f32 0.0, %v769_v15  ;;  %v1109_v11 = vadd.f32 1.4214138, %v1093_v23  ;;  %v2359_v28 = vmul.f32 %v2283_v49, %v914_v35 }
 0x2d2   :  { %v712_v18 = vpop.f32.mrf.mxu2  ;;  %v1078_v32 = vadd.f32 -1.4531521, %v1062_v24  ;;  %v2361_v31 = vmul.f32 0.5, %v710_v40  ;;  %v929_v20 = vsub.f32 1.0, %v928_v50  ;;  %v953_v50 = vand.u32 2147483648, %v2290_v48 }
 0x2d3   :  { %v713_v42 = vadd.f32 %v712_v18, %v2039_v16  ;;  %v2342_v63 = vpop.eup %1545  ;;  %v2347_v39 = vadd.f32 1.0, %v785_v61  ;;  %v1217_v12 = vmul.f32 %v1201_v21, %v769_v15  ;;  %v1125_v3 = vmul.f32 %v1109_v11, %v2296_v57 }
 0x2d4   :  { %v943_v16 = vmul.f32 %v2342_v63, %v2290_v48  ;;  %2948 = vst [vmem:[#allocation44_spill] sm:$0xff] %v2361_v31  ;;  %v1094_v22 = vmul.f32 %v1078_v32, %v2335_v62  ;;  %v1060_v61 = vmul.f32 1.0614054, %v2349_v44  ;;  %v2370_v35 = vpop.eup %1547  ;;  %vm947_vm9 = vweird.f32 %v2290_v48 }
 0x2d5   :  { %v2353_v18 = vmul.f32 0.70710677, %v713_v42  ;;  %1551 = vrcp.f32 %v2347_v39  ;;  %v1141_v47 = vadd.f32 -0.28449672, %v1125_v3  ;;  %v1243_v6 = vmul.f32 1.442695, %v1217_v12 }
 0x2d6   :  { %v944_v40 = vsub.f32 1.0, %v943_v16  ;;  %v1110_v15 = vadd.f32 1.4214138, %v1094_v22  ;;  %v2372_v21 = vpop.eup %1549  ;;  %v1076_v11 = vadd.f32 -1.4531521, %v1060_v61  ;;  %v2381_v16 = vmul.f32 0.5, %v713_v42 }
 0x2d7   :  { %v770_v36 = vand.u32 2147483647, %v2353_v18  ;;  %v1157_v22 = vmul.f32 %v1141_v47, %v2296_v57  ;;  %v2394_v61 = vor.u32 1.1754944e-38, %v953_v50  ;;  %vm948_vm11 = vweird.f32 %v2342_v63 }
 0x2d8   :  { %v1126_v24 = vmul.f32 %v1110_v15, %v2335_v62  ;;  %2949 = vst [vmem:[#allocation45_spill] sm:$0xff] %v2381_v16  ;;  %vm962_vm13 = vweird.f32 %v2347_v39  ;;  %vm2458_vm6 = vmor %vm947_vm9, %vm948_vm11  ;;  %vm933_vm7 = vweird.f32 %v2328_v30 }
 0x2d9   :  { %v786_v23 = vmul.f32 0.3275911, %v770_v36  ;;  %v1202_v52 = vsub.f32 0.0, %v770_v36  ;;  %vm2471_vm4 = vmor %vm932_vm10, %vm933_vm7 }
 0x2da   :  { %v715_v56 = vpop.f32.mrf.mxu2  ;;  %v1142_v3 = vadd.f32 -0.28449672, %v1126_v24 }
 0x2db   :  { %v716_v32 = vadd.f32 %v715_v56, %v2029_v17  ;;  %v2376_v41 = vadd.f32 1.0, %v786_v23  ;;  %v1218_v27 = vmul.f32 %v1202_v52, %v770_v36  ;;  %v2379_v19 = vpop.eup %1551  ;;  %v1092_v17 = vmul.f32 %v1076_v11, %v2349_v44 }
 0x2dc   :  { %v930_v56 = vmul.f32 %v2328_v30, %v929_v20  ;;  %v958_v12 = vmul.f32 %v2379_v19, %v2347_v39  ;;  %v951_v52 = vand.u32 2147483647, %v2290_v48  ;;  %v945_v36 = vmul.f32 %v2342_v63, %v944_v40 }
 0x2dd   :  { %v2383_v53 = vmul.f32 0.70710677, %v716_v32  ;;  %1553 = vrcp.f32 %v2376_v41  ;;  %v1245_v47 = vmul.f32 1.442695, %v1218_v27  ;;  %v1173_v23 = vadd.f32 0.2548296, %v1157_v22 }
 0x2de   :  { %1555 = vpow2.f32 %v1243_v6  ;;  %v1108_v15 = vadd.f32 1.4214138, %v1092_v17  ;;  %v959_v20 = vsub.f32 1.0, %v958_v12  ;;  %v1158_v34 = vmul.f32 %v1142_v3, %v2335_v62 }
 0x2df   :  { %v771_v42 = vand.u32 2147483647, %v2383_v53  ;;  %v2399_v45 = vmul.f32 0.5, %v716_v32  ;;  %v1189_v40 = vmul.f32 %v1173_v23, %v2296_v57  ;;  %v968_v6 = vand.u32 2147483648, %v2347_v39 }
 0x2e0   :  { %v1124_v24 = vmul.f32 %v1108_v15, %v2349_v44  ;;  %v1174_v22 = vadd.f32 0.2548296, %v1158_v34  ;;  %v966_v17 = vand.u32 2147483647, %v2347_v39  ;;  %1557 = vpow2.f32 %v1245_v47 }
 0x2e1   :  { %v787_v11 = vmul.f32 0.3275911, %v771_v42  ;;  %v1203_v16 = vsub.f32 0.0, %v771_v42  ;;  %2950 = vst [vmem:[#allocation46_spill] sm:$0xff] %v2399_v45  ;;  %v1269_v32 = vmul.f32 %v2256_v51, %v1189_v40  ;;  %v960_v57 = vmul.f32 %v2379_v19, %v959_v20 }
 0x2e2   :  { %v1140_v3 = vadd.f32 -0.28449672, %v1124_v24  ;;  %vm2418_vm14 = vcmp.eq.f32.partialorder %v951_v52, 8.507059e+37  ;;  %v1190_v47 = vmul.f32 %v1174_v22, %v2335_v62  ;;  %v969_v20 = vor.u32 1.1754944e-38, %v968_v6 }
 0x2e3   :  { %v2405_v27 = vadd.f32 1.0, %v787_v11  ;;  %v1219_v50 = vmul.f32 %v1203_v16, %v771_v42  ;;  %v2408_v12 = vpop.eup %1553  ;;  %v1285_v23 = vsub.f32 1.0, %v1269_v32  ;;  %vm2428_vm15 = vcmp.eq.f32.partialorder %v966_v17, 8.507059e+37 }
 0x2e4   :  { %v973_v16 = vmul.f32 %v2408_v12, %v2376_v41  ;;  %v2422_v51 = vpop.eup %1555  ;;  %v1156_v15 = vmul.f32 %v1140_v3, %v2349_v44  ;;  %v931_v52 = vadd.f32 %v2328_v30, %v930_v56  ;;  %v981_v22 = vand.u32 2147483647, %v2376_v41 }
 0x2e5   :  { %1559 = vrcp.f32 %v2405_v27  ;;  %v1247_v34 = vmul.f32 1.442695, %v1219_v50  ;;  %v996_v40 = vand.u32 2147483647, %v2405_v27  ;;  %v998_v24 = vand.u32 2147483648, %v2405_v27 }
 0x2e6   :  { %v974_v11 = vsub.f32 1.0, %v973_v16  ;;  %v1270_v50 = vmul.f32 %v2298_v58, %v1190_v47  ;;  %v1317_v7 = vsub.f32 0.0, %v1285_v23  ;;  %v1172_v62 = vadd.f32 0.2548296, %v1156_v15  ;;  %v2446_v58 = vpop.eup %1557 }
 0x2e7   :  { %1561 = vpow2.f32 %v1247_v34  ;;  %vm992_vm1 = vweird.f32 %v2405_v27  ;;  %v983_v17 = vand.u32 2147483648, %v2376_v41  ;;  %vm963_vm2 = vweird.f32 %v2379_v19 }
 0x2e8   :  { %v975_v6 = vmul.f32 %v2408_v12, %v974_v11  ;;  %v2955_v32 = vand.u32 2147483647, %v2270_v26  ;;  %v1286_v3 = vsub.f32 1.0, %v1270_v50  ;;  %v1333_v16 = vsel %vm1301_vm8, %v1285_v23, %v1317_v7  ;;  %vm964_vm10 = vmor %vm962_vm13, %vm963_vm2 }
 0x2e9   :  { %v1188_v34 = vmul.f32 %v1172_v62, %v2349_v44  ;;  %v946_v47 = vadd.f32 %v2342_v63, %v945_v36  ;;  %v1349_v11 = vadd.f32 1.0, %v1333_v16  ;;  %v984_v31 = vor.u32 1.1754944e-38, %v983_v17 }
 0x2ea   :  { %vm2442_vm3 = vcmp.eq.f32.partialorder %v2955_v32, 8.507059e+37  ;;  %v999_v32 = vor.u32 1.1754944e-38, %v998_v24  ;;  %v1318_v7 = vsub.f32 0.0, %v1286_v3  ;;  %vm2465_vm5 = vcmp.eq.f32.partialorder %v996_v40, 8.507059e+37 }
 0x2eb   :  { %v1560_v15 = vpop.eup %1559  ;;  %v1268_v44 = vmul.f32 %v2194_v29, %v1188_v34  ;;  %v1365_v23 = vmul.f32 %v1349_v11, %v2177_v2  ;;  %vm2476_vm9 = vcmp.eq.f32.partialorder %v981_v22, 8.507059e+37  ;;  %v961_v50 = vadd.f32 %v2379_v19, %v960_v57 }
 0x2ec   :  { %v988_v10 = vmul.f32 %v1560_v15, %v2405_v27  ;;  %vm993_vm8 = vweird.f32 %v1560_v15  ;;  %v950_v29 = vsel %vm2458_vm6, %v2342_v63, %v946_v47  ;;  %v935_v40 = vsel %vm2471_vm4, %v2328_v30, %v931_v52 }
 0x2ed   :  { %v2487_v62 = vpop.eup %1561  ;;  %v1334_v2 = vsel %vm1302_vm12, %v1286_v3, %v1318_v7  ;;  %v1284_v22 = vsub.f32 1.0, %v1268_v44  ;;  %v2498_v63 = vsel %vm2418_vm14, %v2394_v61, %v950_v29  ;;  %vm978_vm11 = vweird.f32 %v2408_v12  ;;  %vm2519_vm13 = vmor %vm992_vm1, %vm993_vm8 }
 0x2ee   :  { %v989_v17 = vsub.f32 1.0, %v988_v10  ;;  %v1350_v5 = vadd.f32 1.0, %v1334_v2  ;;  %v965_v30 = vsel %vm964_vm10, %v2379_v19, %v961_v50  ;;  %v1056_v57 = vmul.f32 1.0614054, %v2498_v63 }
 0x2ef   :  { %v1316_v52 = vsub.f32 0.0, %v1284_v22  ;;  %v2505_v3 = vsel %vm2428_vm15, %v969_v20, %v965_v30  ;;  %v2966_v39 = vand.u32 2147483648, %v2270_v26  ;;  %vm902_vm12 = vweird.f32 %v2201_v9 }
 0x2f0   :  { %v990_v38 = vmul.f32 %v1560_v15, %v989_v17  ;;  %v1366_v61 = vmul.f32 %v1350_v5, %v2228_v25  ;;  %v1057_v42 = vmul.f32 1.0614054, %v2505_v3  ;;  %v1072_v34 = vadd.f32 -1.4531521, %v1056_v57 }
 0x2f1   :  { %v939_v16 = vor.u32 1.1754944e-38, %v2966_v39  ;;  %v916_v19 = vadd.f32 %v2283_v49, %v2359_v28  ;;  %v1332_v47 = vsel %vm1300_vm0, %v1284_v22, %v1316_v52  ;;  %vm918_vm14 = vweird.f32 %v2283_v49 }
 0x2f2   :  { %v991_v11 = vadd.f32 %v1560_v15, %v990_v38  ;;  %1395 = vmatpush.msrb.mxu3 %v1366_v61  ;;  %v1348_v26 = vadd.f32 1.0, %v1332_v47  ;;  %v976_v28 = vadd.f32 %v2408_v12, %v975_v6  ;;  %v1073_v43 = vadd.f32 -1.4531521, %v1057_v42 }
 0x2f3   :  { %v2525_v25 = vsel %vm2442_vm3, %v939_v16, %v935_v40  ;;  %v1088_v20 = vmul.f32 %v1072_v34, %v2498_v63  ;;  %vm2969_vm15 = vweird.f32 %v2217_v46  ;;  %vm2972_vm1 = vweird.f32 %v2376_v41 }
 0x2f4   :  { %vm2532_vm0 = vmor %vm2969_vm15, %vm918_vm14  ;;  %v995_v56 = vsel %vm2519_vm13, %v1560_v15, %v991_v11  ;;  %v1055_v10 = vmul.f32 1.0614054, %v2525_v25  ;;  %v921_v7 = vand.u32 2147483647, %v2217_v46  ;;  %1396 = vmatpush.msrb.mxu3 %v1365_v23  ;;  %v1364_v44 = vmul.f32 %v1348_v26, %v2163_v0 }
 0x2f5   :  { %vm979_vm2 = vmor %vm2972_vm1, %vm978_vm11  ;;  %v920_v6 = vsel %vm2532_vm0, %v2283_v49, %v916_v19  ;;  %v2550_v48 = vsel %vm2465_vm5, %v999_v32, %v995_v56  ;;  %v1089_v41 = vmul.f32 %v1073_v43, %v2505_v3  ;;  %v1104_v49 = vadd.f32 1.4214138, %v1088_v20 }
 0x2f6   :  { %v980_v15 = vsel %vm979_vm2, %v2408_v12, %v976_v28  ;;  %v1059_v50 = vmul.f32 1.0614054, %v2550_v48  ;;  %v1071_v40 = vadd.f32 -1.4531521, %v1055_v10  ;;  %1397 = vmatpush.msrb.mxu3 %v1364_v44  ;;  %vm2560_vm3 = vcmp.eq.f32.partialorder %v921_v7, 8.507059e+37 }
 0x2f7   :  { %v2557_v29 = vsel %vm2476_vm9, %v984_v31, %v980_v15  ;;  %v1105_v0 = vadd.f32 1.4214138, %v1089_v41  ;;  %v923_v12 = vand.u32 2147483648, %v2217_v46  ;;  %v1120_v17 = vmul.f32 %v1104_v49, %v2498_v63 }
 0x2f8   :  { %v1058_v23 = vmul.f32 1.0614054, %v2557_v29  ;;  %v1075_v32 = vadd.f32 -1.4531521, %v1059_v50  ;;  %v1087_v2 = vmul.f32 %v1071_v40, %v2525_v25  ;;  %v901_v31 = vadd.f32 %v2247_v13, %v2356_v33 }
 0x2f9   :  { %vm887_vm4 = vweird.f32 %v2114_v1  ;;  %v1121_v22 = vmul.f32 %v1105_v0, %v2505_v3  ;;  %v924_v5 = vor.u32 1.1754944e-38, %v923_v12  ;;  %vm903_vm5 = vweird.f32 %v2247_v13 }
 0x2fa   :  { %v1074_v24 = vadd.f32 -1.4531521, %v1058_v23  ;;  %v1091_v30 = vmul.f32 %v1075_v32, %v2550_v48  ;;  %v1136_v57 = vadd.f32 -0.28449672, %v1120_v17  ;;  %v1103_v46 = vadd.f32 1.4214138, %v1087_v2  ;;  %vm2575_vm6 = vmor %vm902_vm12, %vm903_vm5 }
 0x2fb   :  { %v906_v33 = vand.u32 2147483647, %v2201_v9  ;;  %v1137_v39 = vadd.f32 -0.28449672, %v1121_v22  ;;  %v2583_v16 = vsel %vm2560_vm3, %v924_v5, %v920_v6  ;;  %v905_v61 = vsel %vm2575_vm6, %v2247_v13, %v901_v31 }
 0x2fc   :  { %v1090_v52 = vmul.f32 %v1074_v24, %v2557_v29  ;;  %v1107_v42 = vadd.f32 1.4214138, %v1091_v30  ;;  %v1152_v34 = vmul.f32 %v1136_v57, %v2498_v63  ;;  %v1119_v19 = vmul.f32 %v1103_v46, %v2525_v25 }
 0x2fd   :  { %v1054_v47 = vmul.f32 1.0614054, %v2583_v16  ;;  %v1153_v45 = vmul.f32 %v1137_v39, %v2505_v3  ;;  %vm2592_vm7 = vcmp.eq.f32.partialorder %v906_v33, 8.507059e+37  ;;  %v908_v28 = vand.u32 2147483648, %v2201_v9 }
 0x2fe   :  { %v1106_v11 = vadd.f32 1.4214138, %v1090_v52  ;;  %v1123_v43 = vmul.f32 %v1107_v42, %v2550_v48  ;;  %v1168_v20 = vadd.f32 0.2548296, %v1152_v34  ;;  %v1135_v13 = vadd.f32 -0.28449672, %v1119_v19 }
 0x2ff   :  { %v1070_v27 = vadd.f32 -1.4531521, %v1054_v47  ;;  %vm1296_vm8 = vcmp.ge.f32.partialorder %v2250_v8, 0.0  ;;  %v1169_v10 = vadd.f32 0.2548296, %v1153_v45  ;;  %v909_v6 = vor.u32 1.1754944e-38, %v908_v28 }
 0x300   :  { %v1122_v56 = vmul.f32 %v1106_v11, %v2557_v29  ;;  %v2602_v7 = vadd.f32 %v2166_v14, %v2243_v37  ;;  %vm1297_vm9 = vcmp.ge.f32.partialorder %v2308_v54, 0.0  ;;  %v1139_v44 = vadd.f32 -0.28449672, %v1123_v43  ;;  %v2981_v8 = vld [vmem:[#allocation43_spill] sm:$0xff] }
 0x301   :  { %v1184_v9 = vmul.f32 %v1168_v20, %v2498_v63  ;;  %v1151_v15 = vmul.f32 %v1135_v13, %v2525_v25  ;;  %v1086_v41 = vmul.f32 %v1070_v27, %v2583_v16  ;;  %v1185_v49 = vmul.f32 %v1169_v10, %v2505_v3  ;;  %v2984_v20 = vld [vmem:[#allocation44_spill] sm:$0xff]  ;;  %v2991_v63 = vld [vmem:[#allocation22_spill] sm:$0xff] }
 0x302   :  { %v1138_v50 = vadd.f32 -0.28449672, %v1122_v56  ;;  %v2611_v40 = vsel %vm2592_vm7, %v909_v6, %v905_v61  ;;  %vm888_vm10 = vweird.f32 %v2166_v14  ;;  %v1155_v37 = vmul.f32 %v1139_v44, %v2550_v48 }
 0x303   :  { %v1264_v23 = vmul.f32 %v2372_v21, %v1184_v9  ;;  %v1167_v0 = vadd.f32 0.2548296, %v1151_v15  ;;  %v1102_v36 = vadd.f32 1.4214138, %v1086_v41  ;;  %vm2618_vm11 = vmor %vm887_vm4, %vm888_vm10  ;;  %vm1295_vm12 = vcmp.ge.f32.partialorder %v2230_v60, 0.0  ;;  %v2985_v15 = vld [vmem:[#allocation42_spill] sm:$0xff] }
 0x304   :  { %v1154_v3 = vmul.f32 %v1138_v50, %v2557_v29  ;;  %v1265_v12 = vmul.f32 %v2422_v51, %v1185_v49  ;;  %v1053_v32 = vmul.f32 1.0614054, %v2611_v40  ;;  %v890_v21 = vsel %vm2618_vm11, %v2166_v14, %v2602_v7  ;;  %v2986_v50 = vld [vmem:[#allocation32_spill] sm:$0xff]  ;;  %v2987_v49 = vld [vmem:[#allocation25_spill] sm:$0xff] }
 0x305   :  { %v1171_v17 = vadd.f32 0.2548296, %v1155_v37  ;;  %v1280_v2 = vsub.f32 1.0, %v1264_v23  ;;  %v1183_v31 = vmul.f32 %v1167_v0, %v2525_v25  ;;  %v1118_v24 = vmul.f32 %v1102_v36, %v2583_v16  ;;  %v2988_v0 = vld [vmem:[#allocation40_spill] sm:$0xff] }
 0x306   :  { %vm1299_vm13 = vcmp.ge.f32.partialorder %v2383_v53, 0.0  ;;  %v1170_v22 = vadd.f32 0.2548296, %v1154_v3  ;;  %v1281_v5 = vsub.f32 1.0, %v1265_v12  ;;  %v1069_v30 = vadd.f32 -1.4531521, %v1053_v32 }
 0x307   :  { %v893_v51 = vand.u32 2147483648, %v2114_v1  ;;  %vm872_vm14 = vweird.f32 %v2088_v59  ;;  %vm1298_vm15 = vcmp.ge.f32.partialorder %v2353_v18, 0.0  ;;  %v1187_v57 = vmul.f32 %v1171_v17, %v2550_v48  ;;  %v2992_v17 = vld [vmem:[#allocation46_spill] sm:$0xff] }
 0x308   :  { %v1312_v14 = vsub.f32 0.0, %v1280_v2  ;;  %v1263_v46 = vmul.f32 %v2370_v35, %v1183_v31  ;;  %v1134_v38 = vadd.f32 -0.28449672, %v1118_v24  ;;  %v1186_v25 = vmul.f32 %v1170_v22, %v2557_v29 }
 0x309   :  { %v1313_v33 = vsub.f32 0.0, %v1281_v5  ;;  %v1085_v52 = vmul.f32 %v1069_v30, %v2611_v40  ;;  %v891_v39 = vand.u32 2147483647, %v2114_v1  ;;  %v1267_v61 = vmul.f32 %v2487_v62, %v1187_v57  ;;  %v2994_v30 = vld [vmem:[#allocation45_spill] sm:$0xff] }
 0x30a   :  { %v1328_v42 = vsel %vm1296_vm8, %v1280_v2, %v1312_v14  ;;  %v1279_v34 = vsub.f32 1.0, %v1263_v46  ;;  %v1150_v19 = vmul.f32 %v1134_v38, %v2583_v16  ;;  %v1266_v48 = vmul.f32 %v2446_v58, %v1186_v25  ;;  %v2996_v46 = vld [vmem:[#allocation33_spill] sm:$0xff]  ;;  %v3004_v58 = vld [vmem:[#allocation15_spill] sm:$0xff] }
 0x30b   :  { %v1329_v35 = vsel %vm1297_vm9, %v1281_v5, %v1313_v33  ;;  %v1344_v47 = vadd.f32 1.0, %v1328_v42  ;;  %v1101_v29 = vadd.f32 1.4214138, %v1085_v52  ;;  %v1283_v11 = vsub.f32 1.0, %v1267_v61  ;;  %v2993_v5 = vld [vmem:[#allocation26_spill] sm:$0xff]  ;;  %v2997_v52 = vld [vmem:[#allocation17_spill] sm:$0xff] }
 0x30c   :  { %v1345_v45 = vadd.f32 1.0, %v1329_v35  ;;  %v1311_v26 = vsub.f32 0.0, %v1279_v34  ;;  %v1166_v28 = vadd.f32 0.2548296, %v1150_v19  ;;  %vm857_vm0 = vweird.f32 %v2145_v4  ;;  %v3000_v19 = vld [vmem:[#allocation41_spill] sm:$0xff] }
 0x30d   :  { %vm1294_vm1 = vcmp.ge.f32.partialorder %v2183_v55, 0.0  ;;  %v1282_v1 = vsub.f32 1.0, %v1266_v48  ;;  %v2651_v62 = vmul.f32 %v1344_v47, %v2981_v8  ;;  %v1117_v43 = vmul.f32 %v1101_v29, %v2611_v40 }
 0x30e   :  { %vm2654_vm2 = vcmp.eq.f32.partialorder %v891_v39, 8.507059e+37  ;;  %v1315_v54 = vsub.f32 0.0, %v1283_v11  ;;  %v1361_v13 = vmul.f32 %v1345_v45, %v2984_v20  ;;  %v1327_v27 = vsel %vm1295_vm12, %v1279_v34, %v1311_v26  ;;  %v3002_v45 = vld [vmem:[#allocation28_spill] sm:$0xff] }
 0x30f   :  { %v1182_v56 = vmul.f32 %v1166_v28, %v2583_v16  ;;  %v1314_v10 = vsub.f32 0.0, %v1282_v1  ;;  %v1343_v6 = vadd.f32 1.0, %v1327_v27  ;;  %v1133_v7 = vadd.f32 -0.28449672, %v1117_v43  ;;  %v3003_v28 = vld [vmem:[#allocation38_spill] sm:$0xff] }
 0x310   :  { %v894_v44 = vor.u32 1.1754944e-38, %v893_v51  ;;  %v1331_v9 = vsel %vm1299_vm13, %v1283_v11, %v1315_v54  ;;  %v871_v37 = vadd.f32 %v2987_v49, %v2986_v50  ;;  %vm873_vm3 = vweird.f32 %v2987_v49  ;;  %v3001_v11 = vld [vmem:[#allocation36_spill] sm:$0xff] }
 0x311   :  { %v1262_v41 = vmul.f32 %v2985_v15, %v1182_v56  ;;  %v1347_v23 = vadd.f32 1.0, %v1331_v9  ;;  %v1330_v60 = vsel %vm1298_vm15, %v1282_v1, %v1314_v10  ;;  %v1359_v16 = vmul.f32 %v1343_v6, %v2988_v0  ;;  %vm2674_vm4 = vmor %vm872_vm14, %vm873_vm3  ;;  %v3005_v9 = vld [vmem:[#allocation31_spill] sm:$0xff] }
 0x312   :  { %v1149_v36 = vmul.f32 %v1133_v7, %v2611_v40  ;;  %vm842_vm5 = vweird.f32 %v2991_v63  ;;  %v1346_v3 = vadd.f32 1.0, %v1330_v60  ;;  %v2681_v32 = vsel %vm2654_vm2, %v894_v44, %v890_v21  ;;  %v2995_v21 = vld [vmem:[#allocation39_spill] sm:$0xff] }
 0x313   :  { %v1278_v12 = vsub.f32 1.0, %v1262_v41  ;;  %v875_v18 = vsel %vm2674_vm4, %v2987_v49, %v871_v37  ;;  %v1363_v2 = vmul.f32 %v1347_v23, %v2992_v17  ;;  %v1052_v24 = vmul.f32 1.0614054, %v2681_v32  ;;  %v3006_v15 = vld [vmem:[#allocation23_spill] sm:$0xff] }
 0x314   :  { %v1165_v31 = vadd.f32 0.2548296, %v1149_v36  ;;  %v876_v22 = vand.u32 2147483647, %v2088_v59  ;;  %vm1293_vm6 = vcmp.ge.f32.partialorder %v2993_v5, 0.0  ;;  %v1362_v51 = vmul.f32 %v1346_v3, %v2994_v30 }
 0x315   :  { %v1310_v57 = vsub.f32 0.0, %v1278_v12  ;;  %v878_v14 = vand.u32 2147483648, %v2088_v59  ;;  %v856_v38 = vadd.f32 %v2996_v46, %v2995_v21  ;;  %1398 = vmatpush.msrb.mxu3 %v1363_v2  ;;  %v1068_v33 = vadd.f32 -1.4531521, %v1052_v24 }
 0x316   :  { %v1181_v25 = vmul.f32 %v1165_v31, %v2611_v40  ;;  %vm877_vm7 = vcmp.eq.f32.partialorder %v876_v22, 8.507059e+37  ;;  %vm858_vm8 = vweird.f32 %v2996_v46  ;;  %vm827_vm9 = vweird.f32 %v2997_v52 }
 0x317   :  { %v1326_v39 = vsel %vm1294_vm1, %v1278_v12, %v1310_v57  ;;  %v879_v61 = vor.u32 1.1754944e-38, %v878_v14  ;;  %vm2701_vm10 = vmor %vm857_vm0, %vm858_vm8  ;;  %v861_v42 = vand.u32 2147483647, %v2145_v4  ;;  %v863_v40 = vand.u32 2147483648, %v2145_v4  ;;  %1399 = vmatpush.msrb.mxu3 %v1362_v51  ;;  %v3009_v12 = vld [vmem:[#allocation34_spill] sm:$0xff]  ;;  %v3012_v57 = vld [vmem:[#allocation29_spill] sm:$0xff] }
 0x318   :  { %v1342_v34 = vadd.f32 1.0, %v1326_v39  ;;  %v1261_v48 = vmul.f32 %v3000_v19, %v1181_v25  ;;  %v1084_v35 = vmul.f32 %v1068_v33, %v2681_v32  ;;  %v860_v55 = vsel %vm2701_vm10, %v2996_v46, %v856_v38  ;;  %v3013_v14 = vld [vmem:[#allocation21_spill] sm:$0xff] }
 0x319   :  { %v2712_v47 = vsel %vm877_vm7, %v879_v61, %v875_v18  ;;  %vm862_vm11 = vcmp.eq.f32.partialorder %v861_v42, 8.507059e+37  ;;  %v864_v29 = vor.u32 1.1754944e-38, %v863_v40  ;;  %v841_v26 = vadd.f32 %v3002_v45, %v3001_v11  ;;  %1400 = vmatpush.msrb.mxu3 %v1361_v13  ;;  %v3016_v61 = vld [vmem:[#allocation30_spill] sm:$0xff] }
 0x31a   :  { %v1358_v4 = vmul.f32 %v1342_v34, %v3003_v28  ;;  %v1277_v1 = vsub.f32 1.0, %v1261_v48  ;;  %v1100_v8 = vadd.f32 1.4214138, %v1084_v35  ;;  %v1051_v43 = vmul.f32 1.0614054, %v2712_v47  ;;  %v3017_v34 = vld [vmem:[#allocation35_spill] sm:$0xff] }
 0x31b   :  { %vm812_vm12 = vweird.f32 %v3004_v58  ;;  %v2719_v54 = vsel %vm862_vm11, %v864_v29, %v860_v55  ;;  %vm843_vm13 = vweird.f32 %v3002_v45  ;;  %v846_v20 = vand.u32 2147483647, %v2991_v63  ;;  %1401 = vmatpush.msrb.mxu3 %v2651_v62  ;;  %v3018_v29 = vld [vmem:[#allocation37_spill] sm:$0xff] }
 0x31c   :  { %v848_v27 = vand.u32 2147483648, %v2991_v63  ;;  %v1309_v56 = vsub.f32 0.0, %v1277_v1  ;;  %v1116_v13 = vmul.f32 %v1100_v8, %v2681_v32  ;;  %v1067_v10 = vadd.f32 -1.4531521, %v1051_v43  ;;  %vm844_vm14 = vmor %vm842_vm5, %vm843_vm13  ;;  %v3019_v8 = vld [vmem:[#allocation10_spill] sm:$0xff] }
 0x31d   :  { %v1050_v6 = vmul.f32 1.0614054, %v2719_v54  ;;  %v845_v7 = vsel %vm844_vm14, %v3002_v45, %v841_v26  ;;  %vm847_vm15 = vcmp.eq.f32.partialorder %v846_v20, 8.507059e+37  ;;  %v826_v41 = vadd.f32 %v3006_v15, %v3005_v9  ;;  %1402 = vmatpush.msrb.mxu3 %v1359_v16  ;;  %v3021_v20 = vld [vmem:[#allocation12_spill] sm:$0xff] }
 0x31e   :  { %v849_v44 = vor.u32 1.1754944e-38, %v848_v27  ;;  %v1325_v62 = vsel %vm1293_vm6, %v1277_v1, %v1309_v56  ;;  %v1132_v50 = vadd.f32 -0.28449672, %v1116_v13  ;;  %v1083_v49 = vmul.f32 %v1067_v10, %v2712_v47 }
 0x31f   :  { %v1066_v37 = vadd.f32 -1.4531521, %v1050_v6  ;;  %v1341_v23 = vadd.f32 1.0, %v1325_v62  ;;  %vm828_vm0 = vweird.f32 %v3006_v15  ;;  %v831_v0 = vand.u32 2147483647, %v2997_v52  ;;  %1403 = vmatpush.msrb.mxu3 %v1358_v4 }
 0x320   :  { %v2735_v60 = vsel %vm847_vm15, %v849_v44, %v845_v7  ;;  %v1148_v36 = vmul.f32 %v1132_v50, %v2681_v32  ;;  %v1099_v53 = vadd.f32 1.4214138, %v1083_v49  ;;  %vm2744_vm1 = vmor %vm827_vm9, %vm828_vm0  ;;  %v833_v31 = vand.u32 2147483648, %v2997_v52  ;;  %v3024_v49 = vld [vmem:[#allocation27_spill] sm:$0xff] }
 0x321   :  { %v1082_v16 = vmul.f32 %v1066_v37, %v2719_v54  ;;  %v1049_v63 = vmul.f32 1.0614054, %v2735_v60  ;;  %v1357_v18 = vmul.f32 %v1341_v23, %v3009_v12  ;;  %v830_v17 = vsel %vm2744_vm1, %v3006_v15, %v826_v41  ;;  %v3023_v15 = vld [vmem:[#allocation19_spill] sm:$0xff] }
 0x322   :  { %vm2752_vm2 = vcmp.eq.f32.partialorder %v831_v0, 8.507059e+37  ;;  %v1164_v24 = vadd.f32 0.2548296, %v1148_v36  ;;  %v1115_v22 = vmul.f32 %v1099_v53, %v2712_v47  ;;  %v834_v51 = vor.u32 1.1754944e-38, %v833_v31  ;;  %v3025_v53 = vld [vmem:[#allocation18_spill] sm:$0xff] }
 0x323   :  { %v1098_v5 = vadd.f32 1.4214138, %v1082_v16  ;;  %v1065_v30 = vadd.f32 -1.4531521, %v1049_v63  ;;  %1404 = vmatpush.msrb.mxu3 %v1357_v18  ;;  %v811_v21 = vadd.f32 %v3013_v14, %v3012_v57  ;;  %vm813_vm3 = vweird.f32 %v3013_v14 }
 0x324   :  { %v816_v46 = vand.u32 2147483647, %v3004_v58  ;;  %v1180_v38 = vmul.f32 %v1164_v24, %v2681_v32  ;;  %v1131_v25 = vadd.f32 -0.28449672, %v1115_v22  ;;  %vm2767_vm4 = vmor %vm812_vm12, %vm813_vm3  ;;  %v1227_v59 = vmul.f32 1.442695, %v3016_v61 }
 0x325   :  { %v1114_v33 = vmul.f32 %v1098_v5, %v2719_v54  ;;  %v1081_v52 = vmul.f32 %v1065_v30, %v2735_v60  ;;  %v2774_v42 = vsel %vm2752_vm2, %v834_v51, %v830_v17  ;;  %v815_v32 = vsel %vm2767_vm4, %v3013_v14, %v811_v21  ;;  %v3026_v14 = vld [vmem:[#allocation11_spill] sm:$0xff]  ;;  %v3028_v61 = vld [vmem:[#allocation24_spill] sm:$0xff] }
 0x326   :  { %v818_v40 = vand.u32 2147483648, %v3004_v58  ;;  %v1260_v19 = vmul.f32 %v3017_v34, %v1180_v38  ;;  %v1147_v48 = vmul.f32 %v1131_v25, %v2712_v47  ;;  %1563 = vpow2.f32 %v3018_v29 }
 0x327   :  { %v1130_v35 = vadd.f32 -0.28449672, %v1114_v33  ;;  %v1097_v55 = vadd.f32 1.4214138, %v1081_v52  ;;  %v1048_v11 = vmul.f32 1.0614054, %v2774_v42  ;;  %1565 = vpow2.f32 %v1227_v59 }
 0x328   :  { %vm817_vm5 = vcmp.eq.f32.partialorder %v816_v46, 8.507059e+37  ;;  %v819_v45 = vor.u32 1.1754944e-38, %v818_v40  ;;  %v1276_v26 = vsub.f32 1.0, %v1260_v19  ;;  %v1163_v28 = vadd.f32 0.2548296, %v1147_v48  ;;  %v3027_v46 = vld [vmem:[#allocation13_spill] sm:$0xff] }
 0x329   :  { %v1146_v4 = vmul.f32 %v1130_v35, %v2719_v54  ;;  %v1113_v1 = vmul.f32 %v1097_v55, %v2735_v60  ;;  %v3020_v43 = vsub.f32 0.0, %v3019_v8  ;;  %v3022_v27 = vsub.f32 0.0, %v3021_v20 }
 0x32a   :  { %v1064_v13 = vadd.f32 -1.4531521, %v1048_v11  ;;  %v2792_v10 = vsel %vm817_vm5, %v819_v45, %v815_v32  ;;  %v1308_v6 = vsub.f32 0.0, %v1276_v26  ;;  %v1179_v7 = vmul.f32 %v1163_v28, %v2712_v47 }
 0x32b   :  { %v1207_v58 = vmul.f32 %v3020_v43, %v3019_v8  ;;  %v1208_v56 = vmul.f32 %v3022_v27, %v3021_v20  ;;  %v1162_v44 = vadd.f32 0.2548296, %v1146_v4  ;;  %v1129_v9 = vadd.f32 -0.28449672, %v1113_v1 }
 0x32c   :  { %vm1292_vm6 = vcmp.ge.f32.partialorder %v3023_v15, 0.0  ;;  %v1080_v41 = vmul.f32 %v1064_v13, %v2774_v42  ;;  %v1047_v62 = vmul.f32 1.0614054, %v2792_v10  ;;  %v1259_v37 = vmul.f32 %v3024_v49, %v1179_v7  ;;  %v1564_v36 = vpop.eup %1563  ;;  %v3033_v49 = vld [vmem:[#allocation7_spill] sm:$0xff] }
 0x32d   :  { %v1324_v50 = vsel %vm1292_vm6, %v1276_v26, %v1308_v6  ;;  %v1178_v23 = vmul.f32 %v1162_v44, %v2719_v54  ;;  %v1145_v0 = vmul.f32 %v1129_v9, %v2735_v60  ;;  %v732_v16 = vmul.f32 0.5, %v3025_v53  ;;  %v1566_v57 = vpop.eup %1565  ;;  %v3030_v26 = vld [vmem:[#allocation16_spill] sm:$0xff] }
 0x32e   :  { %v1340_v47 = vadd.f32 1.0, %v1324_v50  ;;  %v1096_v63 = vadd.f32 1.4214138, %v1080_v41  ;;  %v1063_v3 = vadd.f32 -1.4531521, %v1047_v62  ;;  %v1275_v18 = vsub.f32 1.0, %v1259_v37 }
 0x32f   :  { %v1225_v12 = vmul.f32 1.442695, %v1208_v56  ;;  %v1258_v17 = vmul.f32 %v1564_v36, %v1178_v23  ;;  %v1161_v2 = vadd.f32 0.2548296, %v1145_v0  ;;  %v1223_v5 = vmul.f32 1.442695, %v1207_v58 }
 0x330   :  { %v1356_v31 = vmul.f32 %v1340_v47, %v732_v16  ;;  %v1112_v24 = vmul.f32 %v1096_v63, %v2774_v42  ;;  %v1079_v22 = vmul.f32 %v1063_v3, %v2792_v10  ;;  %v1307_v30 = vsub.f32 0.0, %v1275_v18  ;;  %v3031_v58 = vld [vmem:[#allocation14_spill] sm:$0xff]  ;;  %v3032_v62 = vld [vmem:[#allocation9_spill] sm:$0xff]  ;;  %v3034_v36 = vld [vmem:[#allocation8_spill] sm:$0xff] }
 0x331   :  { %v1274_v54 = vsub.f32 1.0, %v1258_v17  ;;  %v1177_v51 = vmul.f32 %v1161_v2, %v2735_v60  ;;  %v731_v21 = vmul.f32 0.5, %v3026_v14  ;;  %vm1291_vm7 = vcmp.ge.f32.partialorder %v3027_v46, 0.0  ;;  %v3029_v60 = vld [vmem:[#allocation20_spill] sm:$0xff]  ;;  %v3035_v47 = vld [vmem:[#allocation6_spill] sm:$0xff]  ;;  %v1370_v2 = vld [vmem:[%s2858_s5 + $0x18] sm:$0xff]  ;;  %v1388_v46 = vpop.permute.xlu1 %1387 }
 0x332   :  { %1405 = vmatpush.msrb.mxu3 %v1356_v31  ;;  %v1128_v38 = vadd.f32 -0.28449672, %v1112_v24  ;;  %v1095_v25 = vadd.f32 1.4214138, %v1079_v22  ;;  %1567 = vpow2.f32 %v1225_v12  ;;  %v1323_v33 = vsel %vm1291_vm7, %v1275_v18, %v1307_v30  ;;  %v1367_v12 = vld [vmem:[%s2858_s5] sm:$0xff]  ;;  %v1368_v18 = vld [vmem:[%s2858_s5 + $0x8] sm:$0xff]  ;;  %v1378_v31 = vpop.permute.xlu2 %1377 }
 0x333   :  { %v1306_v52 = vsub.f32 0.0, %v1274_v54  ;;  %v1257_v39 = vmul.f32 %v1566_v57, %v1177_v51  ;;  %vm1290_vm8 = vcmp.ge.f32.partialorder %v3028_v61, 0.0  ;;  %v1339_v59 = vadd.f32 1.0, %v1323_v33  ;;  %v1369_v17 = vld [vmem:[%s2858_s5 + $0x10] sm:$0xff]  ;;  %v3037_v14 = vld [vmem:[#allocation2_spill] sm:$0xff] }
 0x334   :  { %v1144_v32 = vmul.f32 %v1128_v38, %v2774_v42  ;;  %v1111_v40 = vmul.f32 %v1095_v25, %v2792_v10  ;;  %v730_v34 = vmul.f32 0.5, %v3029_v60  ;;  %1569 = vpow2.f32 %v1223_v5  ;;  %v3036_v5 = vld [vmem:[#allocation3_spill] sm:$0xff]  ;;  %v3038_v33 = vld [vmem:[#allocation4_spill] sm:$0xff] }
 0x335   :  { %v1322_v19 = vsel %vm1290_vm8, %v1274_v54, %v1306_v52  ;;  %v1273_v48 = vsub.f32 1.0, %v1257_v39  ;;  %v1355_v35 = vmul.f32 %v1339_v59, %v731_v21  ;;  %vm1289_vm9 = vcmp.ge.f32.partialorder %v3030_v26, 0.0  ;;  %v1383_v54 = vpop.permute.xlu0 %1382 }
 0x336   :  { %v1338_v55 = vadd.f32 1.0, %v1322_v19  ;;  %v1160_v29 = vadd.f32 0.2548296, %v1144_v32  ;;  %v1127_v11 = vadd.f32 -0.28449672, %v1111_v40  ;;  %v729_v20 = vmul.f32 0.5, %v3031_v58 }
 0x337   :  { %v1305_v45 = vsub.f32 0.0, %v1273_v48  ;;  %1406 = vmatpush.msrb.mxu3 %v1355_v35  ;;  %vm1288_vm10 = vcmp.ge.f32.partialorder %v3032_v62, 0.0  ;;  %v728_v37 = vmul.f32 0.5, %v3033_v49  ;;  %vm1287_vm11 = vcmp.ge.f32.partialorder %v3034_v36, 0.0  ;;  %v3039_v32 = vld [vmem:[#allocation5_spill] sm:$0xff] }
 0x338   :  { %v1354_v28 = vmul.f32 %v1338_v55, %v730_v34  ;;  %v1176_v4 = vmul.f32 %v1160_v29, %v2774_v42  ;;  %v1143_v1 = vmul.f32 %v1127_v11, %v2792_v10  ;;  %v1568_v8 = vpop.eup %1567  ;;  %v727_v63 = vmul.f32 0.5, %v3035_v47 }
 0x339   :  { %v1321_v43 = vsel %vm1289_vm9, %v1273_v48, %v1305_v45 }
 0x33a   :  { %1407 = vmatpush.msrb.mxu3 %v1354_v28  ;;  %v1337_v27 = vadd.f32 1.0, %v1321_v43  ;;  %v1256_v56 = vmul.f32 %v1568_v8, %v1176_v4  ;;  %v1159_v13 = vadd.f32 0.2548296, %v1143_v1  ;;  %v1570_v9 = vpop.eup %1569  ;;  %v1393_v39 = vpop.permute.xlu2 %1392 }
 0x33c   :  { %v1353_v6 = vmul.f32 %v1337_v27, %v729_v20  ;;  %v1272_v7 = vsub.f32 1.0, %v1256_v56  ;;  %v1175_v44 = vmul.f32 %v1159_v13, %v2792_v10 }
 0x33e   :  { %1408 = vmatpush.msrb.mxu3 %v1353_v6  ;;  %v1304_v15 = vsub.f32 0.0, %v1272_v7  ;;  %v1255_v41 = vmul.f32 %v1570_v9, %v1175_v44 }
 0x340   :  { %v1320_v42 = vsel %vm1288_vm10, %v1272_v7, %v1304_v15  ;;  %v1271_v50 = vsub.f32 1.0, %v1255_v41 }
 0x341   :  { %v1336_v23 = vadd.f32 1.0, %v1320_v42 }
 0x342   :  { %v1303_v0 = vsub.f32 0.0, %v1271_v50 }
 0x343   :  { %v1352_v53 = vmul.f32 %v1336_v23, %v728_v37 }
 0x344   :  { %v1319_v16 = vsel %vm1287_vm11, %v1271_v50, %v1303_v0 }
 0x345   :  { %1409 = vmatpush.msrb.mxu3 %v1352_v53  ;;  %v1335_v10 = vadd.f32 1.0, %v1319_v16 }
 0x347   :  { %v1351_v3 = vmul.f32 %v1335_v10, %v727_v63 }
 0x349   :  { %1410 = vmatpush.msrb.mxu3 %v1351_v3 }
 0x34a   :  { %1411 = vmatmul.f32.vlgmr.msrb.gmra.mxu3 %v1367_v12 }
 0x352   :  { %1414 = vmatmul.f32.gmra.mxu3 %v1368_v18 }
 0x35a   :  { %1417 = vmatmul.f32.gmra.mxu3 %v1369_v17 }
 0x362   :  { %1420 = vmatmul.f32.gmra.mxu3 %v1370_v2 }
 0x3cd   :  { %v1412_v24 = vpop.f32.mrf.mxu3 }
 0x3ce   :  { %v1413_v22 = vadd.f32 %v1412_v24, %v1378_v31 }
 0x3d0   :  { %v1424_v30 = vadd.f32 %v1413_v22, %v3036_v5 }
 0x3d2   :  { %1428 = vst [vmem:[%s2859_s11] sm:$0xff] %v1424_v30 }
 0x3d5   :  { %v1415_v51 = vpop.f32.mrf.mxu3 }
 0x3d6   :  { %v1416_v57 = vadd.f32 %v1415_v51, %v1383_v54 }
 0x3d8   :  { %v1425_v21 = vadd.f32 %v1416_v57, %v3037_v14 }
 0x3da   :  { %1429 = vst [vmem:[%s2859_s11 + $0x8] sm:$0xff] %v1425_v21 }
 0x3dd   :  { %v1418_v38 = vpop.f32.mrf.mxu3 }
 0x3de   :  { %v1419_v25 = vadd.f32 %v1418_v38, %v1388_v46 }
 0x3e0   :  { %v1426_v52 = vadd.f32 %v1419_v25, %v3038_v33 }
 0x3e2   :  { %1430 = vst [vmem:[%s2859_s11 + $0x10] sm:$0xff] %v1426_v52 }
 0x3e5   :  { %v1421_v61 = vpop.f32.mrf.mxu3 }
 0x3e6   :  { %v1422_v59 = vadd.f32 %v1421_v61, %v1393_v39 }
 0x3e8   :  { %v1427_v40 = vadd.f32 %v1422_v59, %v3039_v32 }
 0x3ea   :  { %1431 = vst [vmem:[%s2859_s11 + $0x18] sm:$0xff] %v1427_v40 }

</bundles_post_ra>
